<compile_context>
chip_gen: v7x
topology: tpu7x:2x2x1
jax: 0.10.0
libtpu: 0.0.40
codegen_flags: <defaults>
</compile_context>

<pallas_src>
import math
import jax
import jax.numpy as jnp
from jax.experimental import pallas as pl
from jax.experimental.pallas import tpu as pltpu

# ---------------- model dims (small, consistent with the forward) ----------------
BATCH = 2      # len(x1)
SEQ = 8        # token sequence length
HIDDEN = 32    # bert.config.hidden_size (pseudo)
NHEADS = 2
HEAD_DIM = HIDDEN // NHEADS
FFN = 64
VOCAB = 100
VOCAB_PAD = 128   # lane-dense one-hot / contraction dim
LANE = 128        # lane-dense logits output width
ALPHA_AUG = 0.8


# ----------------------------- Pallas kernel --------------------------------------
def _layernorm(x, g, b, eps=1e-5):
    mu = jnp.mean(x, axis=-1, keepdims=True)
    var = jnp.mean((x - mu) ** 2, axis=-1, keepdims=True)
    return (x - mu) * jax.lax.rsqrt(var + eps) * g + b


def ditto_fused_kernel(lam_ref, ids_ref, tok_ref, pos_ref,
                       wq_ref, bq_ref, wk_ref, bk_ref, wv_ref, bv_ref,
                       wo_ref, bo_ref, ln1g_ref, ln1b_ref,
                       w1_ref, b1_ref, w2_ref, b2_ref, ln2g_ref, ln2b_ref,
                       fcw_ref, fcb_ref,
                       logits_ref, enc_ref):
    NS = ids_ref.shape[0]             # N * S (flattened token rows)
    S, H = pos_ref.shape
    N = NS // S
    B = enc_ref.shape[0]              # batch size of x1
    VPAD = tok_ref.shape[0]
    hd = H // NHEADS
    scale = 1.0 / math.sqrt(hd)

    # ---- fused embedding lookup: one-hot(ids) @ tok_emb (MXU) + position -------
    ids = ids_ref[...]                                           # (NS, 1) int32
    vocab_iota = jax.lax.broadcasted_iota(jnp.int32, (NS, VPAD), 1)
    onehot = (vocab_iota == ids).astype(jnp.float32)             # (NS, VPAD)
    x = jnp.dot(onehot, tok_ref[...], preferred_element_type=jnp.float32)
    x = (x.reshape(N, S, H) + pos_ref[...]).reshape(NS, H)       # add pos, keep 2D

    # ---- QKV projections on the flattened (NS, H) LHS --------------------------
    q3 = (jnp.dot(x, wq_ref[...], preferred_element_type=jnp.float32)
          + bq_ref[...]).reshape(N, S, H)
    k3 = (jnp.dot(x, wk_ref[...], preferred_element_type=jnp.float32)
          + bk_ref[...]).reshape(N, S, H)
    v3 = (jnp.dot(x, wv_ref[...], preferred_element_type=jnp.float32)
          + bv_ref[...]).reshape(N, S, H)

    # ---- multi-head attention: batched einsum over batch, static head loop -----
    wo = wo_ref[...]
    attn = jnp.zeros((NS, H), jnp.float32)
    for h in range(NHEADS):                                      # static, 2 iters
        lo = h * hd
        qh = q3[:, :, lo:lo + hd]                                # (N, S, hd)
        kh = k3[:, :, lo:lo + hd]
        vh = v3[:, :, lo:lo + hd]
        s = jnp.einsum('bqd,bkd->bqk', qh, kh,
                       preferred_element_type=jnp.float32) * scale   # (N, S, S)
        m = jnp.max(s, axis=-1, keepdims=True)
        e = jnp.exp(s - m)
        p = e * pl.reciprocal(jnp.sum(e, axis=-1, keepdims=True), approx=True)
        ctx = jnp.einsum('bqk,bkd->bqd', p, vh,
                         preferred_element_type=jnp.float32)         # (N, S, hd)
        # per-head output projection summed -> no concatenate needed
        attn = attn + jnp.dot(ctx.reshape(NS, hd), wo[lo:lo + hd, :],
                              preferred_element_type=jnp.float32)
    attn = attn + bo_ref[...]

    h1 = _layernorm(x + attn, ln1g_ref[...], ln1b_ref[...])         # (NS, H)

    ff = jnp.dot(h1, w1_ref[...], preferred_element_type=jnp.float32) + b1_ref[...]
    # TODO(synk): torch nn.GELU defaults to exact erf GELU; tanh approximation is
    # used here for reliable Mosaic lowering (tiny numerical mismatch).
    ff = jax.nn.gelu(ff)
    ff = jnp.dot(ff, w2_ref[...], preferred_element_type=jnp.float32) + b2_ref[...]
    out = _layernorm(h1 + ff, ln2g_ref[...], ln2b_ref[...])          # (NS, H)

    # ---- fused head: CLS extraction, mixup, fc (lane-dense logits) -------------
    cls = out.reshape(N, S, H)[:, 0, :]                              # (N, H)
    lam = lam_ref[0, 0]
    # when x2 is None, N == B and both slices are the full cls -> enc == cls.
    enc = cls[:B, :] * lam + cls[N - B:, :] * (1.0 - lam)            # (B, H)
    enc_ref[...] = enc
    logits_ref[...] = (jnp.dot(enc, fcw_ref[...],
                               preferred_element_type=jnp.float32)
                       + fcb_ref[...])                               # (B, 128)


# ----------------------------- pallas_call wrapper --------------------------------
def _ditto_pallas(ids2d, lam, p, batch_size):
    """ids2d: (N*S, 1) int32; lam: (1,1) f32; returns (logits (B,2), enc (B,H))."""
    vmem = pl.BlockSpec(memory_space=pltpu.MemorySpace.VMEM)
    smem = pl.BlockSpec(memory_space=pltpu.MemorySpace.SMEM)
    operands = [p["tok_emb_pad"], p["pos_emb"],
                p["wq"], p["bq"], p["wk"], p["bk"], p["wv"], p["bv"],
                p["wo"], p["bo"], p["ln1g"], p["ln1b"],
                p["w1"], p["b1"], p["w2"], p["b2"], p["ln2g"], p["ln2b"],
                p["fc_w_pad"], p["fc_b_pad"]]
    logits_pad, enc = pl.pallas_call(
        ditto_fused_kernel,
        out_shape=(jax.ShapeDtypeStruct((batch_size, LANE), jnp.float32),
                   jax.ShapeDtypeStruct((batch_size, HIDDEN), jnp.float32)),
        in_specs=[smem, vmem] + [vmem] * len(operands),
        out_specs=(vmem, vmem),
    )(lam, ids2d, *operands)
    return logits_pad[:, :2], enc


# ----------------------------- parameter construction -----------------------------
def init_params(key):
    ks = jax.random.split(key, 12)
    s = 0.02
    tok_emb = jax.random.normal(ks[0], (VOCAB, HIDDEN), jnp.float32) * s
    fc_w = jax.random.normal(ks[8], (HIDDEN, 2), jnp.float32) * s
    p = {
        # vocab padded to 128 rows so the one-hot contraction dim is lane-dense
        "tok_emb_pad": jnp.zeros((VOCAB_PAD, HIDDEN), jnp.float32).at[:VOCAB].set(tok_emb),
        "pos_emb": jax.random.normal(ks[1], (SEQ, HIDDEN), jnp.float32) * s,
        "wq": jax.random.normal(ks[2], (HIDDEN, HIDDEN), jnp.float32) * s,
        "bq": jnp.zeros((1, HIDDEN), jnp.float32),
        "wk": jax.random.normal(ks[3], (HIDDEN, HIDDEN), jnp.float32) * s,
        "bk": jnp.zeros((1, HIDDEN), jnp.float32),
        "wv": jax.random.normal(ks[4], (HIDDEN, HIDDEN), jnp.float32) * s,
        "bv": jnp.zeros((1, HIDDEN), jnp.float32),
        "wo": jax.random.normal(ks[5], (HIDDEN, HIDDEN), jnp.float32) * s,
        "bo": jnp.zeros((1, HIDDEN), jnp.float32),
        "ln1g": jnp.ones((1, HIDDEN), jnp.float32),
        "ln1b": jnp.zeros((1, HIDDEN), jnp.float32),
        "w1": jax.random.normal(ks[6], (HIDDEN, FFN), jnp.float32) * s,
        "b1": jnp.zeros((1, FFN), jnp.float32),
        "w2": jax.random.normal(ks[7], (FFN, HIDDEN), jnp.float32) * s,
        "b2": jnp.zeros((1, HIDDEN), jnp.float32),
        "ln2g": jnp.ones((1, HIDDEN), jnp.float32),
        "ln2b": jnp.zeros((1, HIDDEN), jnp.float32),
        # fc = nn.Linear(hidden_size, 2); stored [H, 2], zero-padded to 128 lanes
        "fc_w_pad": jnp.zeros((HIDDEN, LANE), jnp.float32).at[:, :2].set(fc_w),
        "fc_b_pad": jnp.zeros((1, LANE), jnp.float32),
    }
    return p


# ----------------------------- forward (mirrors PyTorch) ---------------------------
def pseudo_ditto_forward(params, x1, x2=None, aug_lam=None):
    """Returns (fc(enc), enc) exactly like PseudoDittoModel.forward."""
    if x2 is not None:
        ids = jnp.concatenate([x1, x2], axis=0)             # torch.cat((x1, x2))
        lam = jnp.asarray(aug_lam, jnp.float32).reshape(1, 1)
    else:
        ids = x1
        lam = jnp.ones((1, 1), jnp.float32)                 # enc = enc1 (no mixup)
    ids2d = ids.reshape(-1, 1).astype(jnp.int32)            # (N*S, 1)
    return _ditto_pallas(ids2d, lam, params, x1.shape[0])


# ----------------------------------- main ------------------------------------------
if __name__ == "__main__":
    key = jax.random.PRNGKey(0)
    k_param, k_x1, k_x2, k_lam = jax.random.split(key, 4)

    params = init_params(k_param)
    x1 = jax.random.randint(k_x1, (BATCH, SEQ), 0, VOCAB, dtype=jnp.int32)
    x2 = jax.random.randint(k_x2, (BATCH, SEQ), 0, VOCAB, dtype=jnp.int32)

    # deterministic stand-in for np.random.beta(alpha_aug, alpha_aug)
    aug_lam = jax.random.beta(k_lam, ALPHA_AUG, ALPHA_AUG)

    fwd = jax.jit(pseudo_ditto_forward)

    logits, enc = fwd(params, x1, x2, aug_lam)
    jax.block_until_ready((logits, enc))

    # also exercise the x2=None branch
    logits1, enc1 = fwd(params, x1)
    jax.block_until_ready((logits1, enc1))

    assert logits.shape == (BATCH, 2) and enc.shape == (BATCH, HIDDEN)
    assert logits1.shape == (BATCH, 2) and enc1.shape == (BATCH, HIDDEN)
    print("KERNEL_OK")
</pallas_src>

<mosaic_0001>
module attributes {stable_mosaic.version = 11 : i64} {
  func.func @ditto_fused_kernel(%arg0: memref<1x1xf32, #tpu.memory_space<smem>>, %arg1: memref<32x1xi32, #tpu.memory_space<vmem>>, %arg2: memref<128x32xf32, #tpu.memory_space<vmem>>, %arg3: memref<8x32xf32, #tpu.memory_space<vmem>>, %arg4: memref<32x32xf32, #tpu.memory_space<vmem>>, %arg5: memref<1x32xf32, #tpu.memory_space<vmem>>, %arg6: memref<32x32xf32, #tpu.memory_space<vmem>>, %arg7: memref<1x32xf32, #tpu.memory_space<vmem>>, %arg8: memref<32x32xf32, #tpu.memory_space<vmem>>, %arg9: memref<1x32xf32, #tpu.memory_space<vmem>>, %arg10: memref<32x32xf32, #tpu.memory_space<vmem>>, %arg11: memref<1x32xf32, #tpu.memory_space<vmem>>, %arg12: memref<1x32xf32, #tpu.memory_space<vmem>>, %arg13: memref<1x32xf32, #tpu.memory_space<vmem>>, %arg14: memref<32x64xf32, #tpu.memory_space<vmem>>, %arg15: memref<1x64xf32, #tpu.memory_space<vmem>>, %arg16: memref<64x32xf32, #tpu.memory_space<vmem>>, %arg17: memref<1x32xf32, #tpu.memory_space<vmem>>, %arg18: memref<1x32xf32, #tpu.memory_space<vmem>>, %arg19: memref<1x32xf32, #tpu.memory_space<vmem>>, %arg20: memref<32x128xf32, #tpu.memory_space<vmem>>, %arg21: memref<1x128xf32, #tpu.memory_space<vmem>>, %arg22: memref<2x128xf32, #tpu.memory_space<vmem>>, %arg23: memref<2x32xf32, #tpu.memory_space<vmem>>) attributes {dimension_semantics = [], scalar_prefetch = 0 : i64, scratch_operands = 0 : i64, tpu.core_type = #tpu.core_type<tc>} {
    %c0 = arith.constant 0 : index
    %c0_0 = arith.constant 0 : index
    %0 = vector.load %arg1[%c0, %c0_0] : memref<32x1xi32, #tpu.memory_space<vmem>>, vector<32x1xi32>
    %1 = tpu.iota {dimensions = array<i32: 1>} : vector<32x128xi32>
    %2 = vector.broadcast %0 : vector<32x1xi32> to vector<32x128xi32>
    %3 = arith.cmpi eq, %1, %2 : vector<32x128xi32>
    %4 = arith.extui %3 : vector<32x128xi1> to vector<32x128xi32>
    %5 = arith.sitofp %4 : vector<32x128xi32> to vector<32x128xf32>
    %c0_1 = arith.constant 0 : index
    %c0_2 = arith.constant 0 : index
    %6 = vector.load %arg2[%c0_1, %c0_2] : memref<128x32xf32, #tpu.memory_space<vmem>>, vector<128x32xf32>
    %cst = arith.constant dense<0.000000e+00> : vector<32x32xf32>
    %7 = tpu.matmul %5, %6, %cst {dimension_numbers = #tpu.dot_dimension_numbers<[1], [0], [0], [1], [0, 0, 1, 1], [], []>} : vector<32x128xf32>, vector<128x32xf32>, vector<32x32xf32> -> vector<32x32xf32>
    %8 = vector.shape_cast %7 : vector<32x32xf32> to vector<4x8x32xf32>
    %c0_3 = arith.constant 0 : index
    %c0_4 = arith.constant 0 : index
    %9 = vector.load %arg3[%c0_3, %c0_4] : memref<8x32xf32, #tpu.memory_space<vmem>>, vector<8x32xf32>
    %10 = vector.shape_cast %9 : vector<8x32xf32> to vector<1x8x32xf32>
    %11 = vector.broadcast %10 : vector<1x8x32xf32> to vector<4x8x32xf32>
    %12 = arith.addf %8, %11 : vector<4x8x32xf32>
    %13 = vector.shape_cast %12 : vector<4x8x32xf32> to vector<32x32xf32>
    %c0_5 = arith.constant 0 : index
    %c0_6 = arith.constant 0 : index
    %14 = vector.load %arg4[%c0_5, %c0_6] : memref<32x32xf32, #tpu.memory_space<vmem>>, vector<32x32xf32>
    %cst_7 = arith.constant dense<0.000000e+00> : vector<32x32xf32>
    %15 = tpu.matmul %13, %14, %cst_7 {dimension_numbers = #tpu.dot_dimension_numbers<[1], [0], [0], [1], [0, 0, 1, 1], [], []>} : vector<32x32xf32>, vector<32x32xf32>, vector<32x32xf32> -> vector<32x32xf32>
    %c0_8 = arith.constant 0 : index
    %c0_9 = arith.constant 0 : index
    %16 = vector.load %arg5[%c0_8, %c0_9] : memref<1x32xf32, #tpu.memory_space<vmem>>, vector<1x32xf32>
    %17 = vector.broadcast %16 : vector<1x32xf32> to vector<32x32xf32>
    %18 = arith.addf %15, %17 : vector<32x32xf32>
    %19 = vector.shape_cast %18 : vector<32x32xf32> to vector<4x8x32xf32>
    %c0_10 = arith.constant 0 : index
    %c0_11 = arith.constant 0 : index
    %20 = vector.load %arg6[%c0_10, %c0_11] : memref<32x32xf32, #tpu.memory_space<vmem>>, vector<32x32xf32>
    %cst_12 = arith.constant dense<0.000000e+00> : vector<32x32xf32>
    %21 = tpu.matmul %13, %20, %cst_12 {dimension_numbers = #tpu.dot_dimension_numbers<[1], [0], [0], [1], [0, 0, 1, 1], [], []>} : vector<32x32xf32>, vector<32x32xf32>, vector<32x32xf32> -> vector<32x32xf32>
    %c0_13 = arith.constant 0 : index
    %c0_14 = arith.constant 0 : index
    %22 = vector.load %arg7[%c0_13, %c0_14] : memref<1x32xf32, #tpu.memory_space<vmem>>, vector<1x32xf32>
    %23 = vector.broadcast %22 : vector<1x32xf32> to vector<32x32xf32>
    %24 = arith.addf %21, %23 : vector<32x32xf32>
    %25 = vector.shape_cast %24 : vector<32x32xf32> to vector<4x8x32xf32>
    %c0_15 = arith.constant 0 : index
    %c0_16 = arith.constant 0 : index
    %26 = vector.load %arg8[%c0_15, %c0_16] : memref<32x32xf32, #tpu.memory_space<vmem>>, vector<32x32xf32>
    %cst_17 = arith.constant dense<0.000000e+00> : vector<32x32xf32>
    %27 = tpu.matmul %13, %26, %cst_17 {dimension_numbers = #tpu.dot_dimension_numbers<[1], [0], [0], [1], [0, 0, 1, 1], [], []>} : vector<32x32xf32>, vector<32x32xf32>, vector<32x32xf32> -> vector<32x32xf32>
    %c0_18 = arith.constant 0 : index
    %c0_19 = arith.constant 0 : index
    %28 = vector.load %arg9[%c0_18, %c0_19] : memref<1x32xf32, #tpu.memory_space<vmem>>, vector<1x32xf32>
    %29 = vector.broadcast %28 : vector<1x32xf32> to vector<32x32xf32>
    %30 = arith.addf %27, %29 : vector<32x32xf32>
    %31 = vector.shape_cast %30 : vector<32x32xf32> to vector<4x8x32xf32>
    %c0_20 = arith.constant 0 : index
    %c0_21 = arith.constant 0 : index
    %32 = vector.load %arg10[%c0_20, %c0_21] : memref<32x32xf32, #tpu.memory_space<vmem>>, vector<32x32xf32>
    %cst_22 = arith.constant 0.000000e+00 : f32
    %33 = vector.broadcast %cst_22 : f32 to vector<32x32xf32>
    %34 = vector.extract_strided_slice %19 {offsets = [0, 0, 0], sizes = [4, 8, 16], strides = [1, 1, 1]} : vector<4x8x32xf32> to vector<4x8x16xf32>
    %35 = vector.extract_strided_slice %25 {offsets = [0, 0, 0], sizes = [4, 8, 16], strides = [1, 1, 1]} : vector<4x8x32xf32> to vector<4x8x16xf32>
    %36 = vector.extract_strided_slice %31 {offsets = [0, 0, 0], sizes = [4, 8, 16], strides = [1, 1, 1]} : vector<4x8x32xf32> to vector<4x8x16xf32>
    "tpu.trace_start"() <{level = 10 : i32, message = "bqd,bkd->bqk"}> : () -> ()
    %cst_23 = arith.constant dense<0.000000e+00> : vector<4x8x8xf32>
    %37 = tpu.matmul %34, %35, %cst_23 {dimension_numbers = #tpu.dot_dimension_numbers<[2], [2], [1], [1], [0, 0, 0, 1, 1, 1], [0], [0]>} : vector<4x8x16xf32>, vector<4x8x16xf32>, vector<4x8x8xf32> -> vector<4x8x8xf32>
    "tpu.trace_stop"() : () -> ()
    %cst_24 = arith.constant 2.500000e-01 : f32
    %38 = vector.broadcast %cst_24 : f32 to vector<4x8x8xf32>
    %39 = arith.mulf %37, %38 : vector<4x8x8xf32>
    %cst_25 = arith.constant dense<0xFF800000> : vector<4x8xf32>
    %40 = vector.multi_reduction <maximumf>, %39, %cst_25 [2] : vector<4x8x8xf32> to vector<4x8xf32>
    %41 = vector.shape_cast %40 : vector<4x8xf32> to vector<4x8x1xf32>
    %42 = vector.broadcast %41 : vector<4x8x1xf32> to vector<4x8x8xf32>
    %43 = arith.subf %39, %42 : vector<4x8x8xf32>
    %44 = math.exp %43 : vector<4x8x8xf32>
    %cst_26 = arith.constant dense<0.000000e+00> : vector<4x8xf32>
    %45 = vector.multi_reduction <add>, %44, %cst_26 [2] : vector<4x8x8xf32> to vector<4x8xf32>
    %46 = vector.shape_cast %45 : vector<4x8xf32> to vector<4x8x1xf32>
    %47 = tpu.reciprocal %46 {approx = true} : vector<4x8x1xf32> -> vector<4x8x1xf32>
    %48 = vector.broadcast %47 : vector<4x8x1xf32> to vector<4x8x8xf32>
    %49 = arith.mulf %44, %48 : vector<4x8x8xf32>
    "tpu.trace_start"() <{level = 10 : i32, message = "bqk,bkd->bqd"}> : () -> ()
    %cst_27 = arith.constant dense<0.000000e+00> : vector<4x8x16xf32>
    %50 = tpu.matmul %49, %36, %cst_27 {dimension_numbers = #tpu.dot_dimension_numbers<[2], [1], [1], [2], [0, 0, 0, 1, 1, 2], [0], [0]>} : vector<4x8x8xf32>, vector<4x8x16xf32>, vector<4x8x16xf32> -> vector<4x8x16xf32>
    "tpu.trace_stop"() : () -> ()
    %51 = vector.shape_cast %50 : vector<4x8x16xf32> to vector<32x16xf32>
    %52 = vector.extract_strided_slice %32 {offsets = [0, 0], sizes = [16, 32], strides = [1, 1]} : vector<32x32xf32> to vector<16x32xf32>
    %cst_28 = arith.constant dense<0.000000e+00> : vector<32x32xf32>
    %53 = tpu.matmul %51, %52, %cst_28 {dimension_numbers = #tpu.dot_dimension_numbers<[1], [0], [0], [1], [0, 0, 1, 1], [], []>} : vector<32x16xf32>, vector<16x32xf32>, vector<32x32xf32> -> vector<32x32xf32>
    %54 = arith.addf %33, %53 : vector<32x32xf32>
    %55 = vector.extract_strided_slice %19 {offsets = [0, 0, 16], sizes = [4, 8, 16], strides = [1, 1, 1]} : vector<4x8x32xf32> to vector<4x8x16xf32>
    %56 = vector.extract_strided_slice %25 {offsets = [0, 0, 16], sizes = [4, 8, 16], strides = [1, 1, 1]} : vector<4x8x32xf32> to vector<4x8x16xf32>
    %57 = vector.extract_strided_slice %31 {offsets = [0, 0, 16], sizes = [4, 8, 16], strides = [1, 1, 1]} : vector<4x8x32xf32> to vector<4x8x16xf32>
    "tpu.trace_start"() <{level = 10 : i32, message = "bqd,bkd->bqk"}> : () -> ()
    %cst_29 = arith.constant dense<0.000000e+00> : vector<4x8x8xf32>
    %58 = tpu.matmul %55, %56, %cst_29 {dimension_numbers = #tpu.dot_dimension_numbers<[2], [2], [1], [1], [0, 0, 0, 1, 1, 1], [0], [0]>} : vector<4x8x16xf32>, vector<4x8x16xf32>, vector<4x8x8xf32> -> vector<4x8x8xf32>
    "tpu.trace_stop"() : () -> ()
    %cst_30 = arith.constant 2.500000e-01 : f32
    %59 = vector.broadcast %cst_30 : f32 to vector<4x8x8xf32>
    %60 = arith.mulf %58, %59 : vector<4x8x8xf32>
    %cst_31 = arith.constant dense<0xFF800000> : vector<4x8xf32>
    %61 = vector.multi_reduction <maximumf>, %60, %cst_31 [2] : vector<4x8x8xf32> to vector<4x8xf32>
    %62 = vector.shape_cast %61 : vector<4x8xf32> to vector<4x8x1xf32>
    %63 = vector.broadcast %62 : vector<4x8x1xf32> to vector<4x8x8xf32>
    %64 = arith.subf %60, %63 : vector<4x8x8xf32>
    %65 = math.exp %64 : vector<4x8x8xf32>
    %cst_32 = arith.constant dense<0.000000e+00> : vector<4x8xf32>
    %66 = vector.multi_reduction <add>, %65, %cst_32 [2] : vector<4x8x8xf32> to vector<4x8xf32>
    %67 = vector.shape_cast %66 : vector<4x8xf32> to vector<4x8x1xf32>
    %68 = tpu.reciprocal %67 {approx = true} : vector<4x8x1xf32> -> vector<4x8x1xf32>
    %69 = vector.broadcast %68 : vector<4x8x1xf32> to vector<4x8x8xf32>
    %70 = arith.mulf %65, %69 : vector<4x8x8xf32>
    "tpu.trace_start"() <{level = 10 : i32, message = "bqk,bkd->bqd"}> : () -> ()
    %cst_33 = arith.constant dense<0.000000e+00> : vector<4x8x16xf32>
    %71 = tpu.matmul %70, %57, %cst_33 {dimension_numbers = #tpu.dot_dimension_numbers<[2], [1], [1], [2], [0, 0, 0, 1, 1, 2], [0], [0]>} : vector<4x8x8xf32>, vector<4x8x16xf32>, vector<4x8x16xf32> -> vector<4x8x16xf32>
    "tpu.trace_stop"() : () -> ()
    %72 = vector.shape_cast %71 : vector<4x8x16xf32> to vector<32x16xf32>
    %73 = vector.extract_strided_slice %32 {offsets = [16, 0], sizes = [16, 32], strides = [1, 1]} : vector<32x32xf32> to vector<16x32xf32>
    %cst_34 = arith.constant dense<0.000000e+00> : vector<32x32xf32>
    %74 = tpu.matmul %72, %73, %cst_34 {dimension_numbers = #tpu.dot_dimension_numbers<[1], [0], [0], [1], [0, 0, 1, 1], [], []>} : vector<32x16xf32>, vector<16x32xf32>, vector<32x32xf32> -> vector<32x32xf32>
    %75 = arith.addf %54, %74 : vector<32x32xf32>
    %c0_35 = arith.constant 0 : index
    %c0_36 = arith.constant 0 : index
    %76 = vector.load %arg11[%c0_35, %c0_36] : memref<1x32xf32, #tpu.memory_space<vmem>>, vector<1x32xf32>
    %77 = vector.broadcast %76 : vector<1x32xf32> to vector<32x32xf32>
    %78 = arith.addf %75, %77 : vector<32x32xf32>
    %79 = arith.addf %13, %78 : vector<32x32xf32>
    %c0_37 = arith.constant 0 : index
    %c0_38 = arith.constant 0 : index
    %80 = vector.load %arg12[%c0_37, %c0_38] : memref<1x32xf32, #tpu.memory_space<vmem>>, vector<1x32xf32>
    %c0_39 = arith.constant 0 : index
    %c0_40 = arith.constant 0 : index
    %81 = vector.load %arg13[%c0_39, %c0_40] : memref<1x32xf32, #tpu.memory_space<vmem>>, vector<1x32xf32>
    %cst_41 = arith.constant dense<0.000000e+00> : vector<32xf32>
    %82 = vector.multi_reduction <add>, %79, %cst_41 [1] : vector<32x32xf32> to vector<32xf32>
    %83 = vector.shape_cast %82 : vector<32xf32> to vector<32x1xf32>
    %cst_42 = arith.constant 3.200000e+01 : f32
    %84 = vector.broadcast %cst_42 : f32 to vector<32x1xf32>
    %85 = arith.divf %83, %84 : vector<32x1xf32>
    %86 = vector.broadcast %85 : vector<32x1xf32> to vector<32x32xf32>
    %87 = arith.subf %79, %86 : vector<32x32xf32>
    %88 = arith.mulf %87, %87 : vector<32x32xf32>
    %cst_43 = arith.constant dense<0.000000e+00> : vector<32xf32>
    %89 = vector.multi_reduction <add>, %88, %cst_43 [1] : vector<32x32xf32> to vector<32xf32>
    %90 = vector.shape_cast %89 : vector<32xf32> to vector<32x1xf32>
    %cst_44 = arith.constant 3.200000e+01 : f32
    %91 = vector.broadcast %cst_44 : f32 to vector<32x1xf32>
    %92 = arith.divf %90, %91 : vector<32x1xf32>
    %93 = vector.broadcast %85 : vector<32x1xf32> to vector<32x32xf32>
    %94 = arith.subf %79, %93 : vector<32x32xf32>
    %cst_45 = arith.constant 9.99999974E-6 : f32
    %95 = vector.broadcast %cst_45 : f32 to vector<32x1xf32>
    %96 = arith.addf %92, %95 : vector<32x1xf32>
    %97 = math.rsqrt %96 : vector<32x1xf32>
    %98 = vector.broadcast %97 : vector<32x1xf32> to vector<32x32xf32>
    %99 = arith.mulf %94, %98 : vector<32x32xf32>
    %100 = vector.broadcast %80 : vector<1x32xf32> to vector<32x32xf32>
    %101 = arith.mulf %99, %100 : vector<32x32xf32>
    %102 = vector.broadcast %81 : vector<1x32xf32> to vector<32x32xf32>
    %103 = arith.addf %101, %102 : vector<32x32xf32>
    %c0_46 = arith.constant 0 : index
    %c0_47 = arith.constant 0 : index
    %104 = vector.load %arg14[%c0_46, %c0_47] : memref<32x64xf32, #tpu.memory_space<vmem>>, vector<32x64xf32>
    %cst_48 = arith.constant dense<0.000000e+00> : vector<32x64xf32>
    %105 = tpu.matmul %103, %104, %cst_48 {dimension_numbers = #tpu.dot_dimension_numbers<[1], [0], [0], [1], [0, 0, 1, 1], [], []>} : vector<32x32xf32>, vector<32x64xf32>, vector<32x64xf32> -> vector<32x64xf32>
    %c0_49 = arith.constant 0 : index
    %c0_50 = arith.constant 0 : index
    %106 = vector.load %arg15[%c0_49, %c0_50] : memref<1x64xf32, #tpu.memory_space<vmem>>, vector<1x64xf32>
    %107 = vector.broadcast %106 : vector<1x64xf32> to vector<32x64xf32>
    %108 = arith.addf %105, %107 : vector<32x64xf32>
    %109 = arith.mulf %108, %108 : vector<32x64xf32>
    %110 = arith.mulf %108, %109 : vector<32x64xf32>
    %cst_51 = arith.constant 4.471500e-02 : f32
    %111 = vector.broadcast %cst_51 : f32 to vector<32x64xf32>
    %112 = arith.mulf %111, %110 : vector<32x64xf32>
    %113 = arith.addf %108, %112 : vector<32x64xf32>
    %cst_52 = arith.constant 0.797884583 : f32
    %114 = vector.broadcast %cst_52 : f32 to vector<32x64xf32>
    %115 = arith.mulf %114, %113 : vector<32x64xf32>
    %116 = math.tanh %115 : vector<32x64xf32>
    %cst_53 = arith.constant 1.000000e+00 : f32
    %117 = vector.broadcast %cst_53 : f32 to vector<32x64xf32>
    %118 = arith.addf %117, %116 : vector<32x64xf32>
    %cst_54 = arith.constant 5.000000e-01 : f32
    %119 = vector.broadcast %cst_54 : f32 to vector<32x64xf32>
    %120 = arith.mulf %119, %118 : vector<32x64xf32>
    %121 = arith.mulf %108, %120 : vector<32x64xf32>
    %c0_55 = arith.constant 0 : index
    %c0_56 = arith.constant 0 : index
    %122 = vector.load %arg16[%c0_55, %c0_56] : memref<64x32xf32, #tpu.memory_space<vmem>>, vector<64x32xf32>
    %cst_57 = arith.constant dense<0.000000e+00> : vector<32x32xf32>
    %123 = tpu.matmul %121, %122, %cst_57 {dimension_numbers = #tpu.dot_dimension_numbers<[1], [0], [0], [1], [0, 0, 1, 1], [], []>} : vector<32x64xf32>, vector<64x32xf32>, vector<32x32xf32> -> vector<32x32xf32>
    %c0_58 = arith.constant 0 : index
    %c0_59 = arith.constant 0 : index
    %124 = vector.load %arg17[%c0_58, %c0_59] : memref<1x32xf32, #tpu.memory_space<vmem>>, vector<1x32xf32>
    %125 = vector.broadcast %124 : vector<1x32xf32> to vector<32x32xf32>
    %126 = arith.addf %123, %125 : vector<32x32xf32>
    %127 = arith.addf %103, %126 : vector<32x32xf32>
    %c0_60 = arith.constant 0 : index
    %c0_61 = arith.constant 0 : index
    %128 = vector.load %arg18[%c0_60, %c0_61] : memref<1x32xf32, #tpu.memory_space<vmem>>, vector<1x32xf32>
    %c0_62 = arith.constant 0 : index
    %c0_63 = arith.constant 0 : index
    %129 = vector.load %arg19[%c0_62, %c0_63] : memref<1x32xf32, #tpu.memory_space<vmem>>, vector<1x32xf32>
    %cst_64 = arith.constant dense<0.000000e+00> : vector<32xf32>
    %130 = vector.multi_reduction <add>, %127, %cst_64 [1] : vector<32x32xf32> to vector<32xf32>
    %131 = vector.shape_cast %130 : vector<32xf32> to vector<32x1xf32>
    %cst_65 = arith.constant 3.200000e+01 : f32
    %132 = vector.broadcast %cst_65 : f32 to vector<32x1xf32>
    %133 = arith.divf %131, %132 : vector<32x1xf32>
    %134 = vector.broadcast %133 : vector<32x1xf32> to vector<32x32xf32>
    %135 = arith.subf %127, %134 : vector<32x32xf32>
    %136 = arith.mulf %135, %135 : vector<32x32xf32>
    %cst_66 = arith.constant dense<0.000000e+00> : vector<32xf32>
    %137 = vector.multi_reduction <add>, %136, %cst_66 [1] : vector<32x32xf32> to vector<32xf32>
    %138 = vector.shape_cast %137 : vector<32xf32> to vector<32x1xf32>
    %cst_67 = arith.constant 3.200000e+01 : f32
    %139 = vector.broadcast %cst_67 : f32 to vector<32x1xf32>
    %140 = arith.divf %138, %139 : vector<32x1xf32>
    %141 = vector.broadcast %133 : vector<32x1xf32> to vector<32x32xf32>
    %142 = arith.subf %127, %141 : vector<32x32xf32>
    %cst_68 = arith.constant 9.99999974E-6 : f32
    %143 = vector.broadcast %cst_68 : f32 to vector<32x1xf32>
    %144 = arith.addf %140, %143 : vector<32x1xf32>
    %145 = math.rsqrt %144 : vector<32x1xf32>
    %146 = vector.broadcast %145 : vector<32x1xf32> to vector<32x32xf32>
    %147 = arith.mulf %142, %146 : vector<32x32xf32>
    %148 = vector.broadcast %128 : vector<1x32xf32> to vector<32x32xf32>
    %149 = arith.mulf %147, %148 : vector<32x32xf32>
    %150 = vector.broadcast %129 : vector<1x32xf32> to vector<32x32xf32>
    %151 = arith.addf %149, %150 : vector<32x32xf32>
    %152 = vector.shape_cast %151 : vector<32x32xf32> to vector<4x8x32xf32>
    %153 = vector.extract_strided_slice %152 {offsets = [0, 0, 0], sizes = [4, 1, 32], strides = [1, 1, 1]} : vector<4x8x32xf32> to vector<4x1x32xf32>
    %154 = vector.shape_cast %153 : vector<4x1x32xf32> to vector<4x32xf32>
    %c0_69 = arith.constant 0 : index
    %c0_70 = arith.constant 0 : index
    %155 = memref.load %arg0[%c0_69, %c0_70] : memref<1x1xf32, #tpu.memory_space<smem>>
    %156 = vector.extract_strided_slice %154 {offsets = [0, 0], sizes = [2, 32], strides = [1, 1]} : vector<4x32xf32> to vector<2x32xf32>
    %157 = vector.broadcast %155 : f32 to vector<2x32xf32>
    %158 = arith.mulf %156, %157 : vector<2x32xf32>
    %159 = vector.extract_strided_slice %154 {offsets = [2, 0], sizes = [2, 32], strides = [1, 1]} : vector<4x32xf32> to vector<2x32xf32>
    %cst_71 = arith.constant 1.000000e+00 : f32
    %160 = arith.subf %cst_71, %155 : f32
    %161 = vector.broadcast %160 : f32 to vector<2x32xf32>
    %162 = arith.mulf %159, %161 : vector<2x32xf32>
    %163 = arith.addf %158, %162 : vector<2x32xf32>
    %c0_72 = arith.constant 0 : index
    %c0_73 = arith.constant 0 : index
    %164 = vector.load %arg23[%c0_72, %c0_73] : memref<2x32xf32, #tpu.memory_space<vmem>>, vector<2x32xf32>
    tpu.vector_store %arg23[%c0_72, %c0_73], %163 {strides = array<i32>} : memref<2x32xf32, #tpu.memory_space<vmem>>, vector<2x32xf32>,
    %c0_74 = arith.constant 0 : index
    %c0_75 = arith.constant 0 : index
    %165 = vector.load %arg20[%c0_74, %c0_75] : memref<32x128xf32, #tpu.memory_space<vmem>>, vector<32x128xf32>
    %cst_76 = arith.constant dense<0.000000e+00> : vector<2x128xf32>
    %166 = tpu.matmul %163, %165, %cst_76 {dimension_numbers = #tpu.dot_dimension_numbers<[1], [0], [0], [1], [0, 0, 1, 1], [], []>} : vector<2x32xf32>, vector<32x128xf32>, vector<2x128xf32> -> vector<2x128xf32>
    %c0_77 = arith.constant 0 : index
    %c0_78 = arith.constant 0 : index
    %167 = vector.load %arg21[%c0_77, %c0_78] : memref<1x128xf32, #tpu.memory_space<vmem>>, vector<1x128xf32>
    %168 = vector.broadcast %167 : vector<1x128xf32> to vector<2x128xf32>
    %169 = arith.addf %166, %168 : vector<2x128xf32>
    %c0_79 = arith.constant 0 : index
    %c0_80 = arith.constant 0 : index
    %170 = vector.load %arg22[%c0_79, %c0_80] : memref<2x128xf32, #tpu.memory_space<vmem>>, vector<2x128xf32>
    tpu.vector_store %arg22[%c0_79, %c0_80], %169 {strides = array<i32>} : memref<2x128xf32, #tpu.memory_space<vmem>>, vector<2x128xf32>,
    return
  }
}

</mosaic_0001>

<bundles_post_ra>
// kernel: pseudo_ditto_forward.1
= control target key start
LH: loop header
LB: loop body
LE: loop exit
PB: predicated region body
PF: predicated region fallthrough
CT: control target
= control target key end

     0   :  { %s3793_s0 = inlined_call_operand.<no memory space> [shape: f32[1,1], index: 0, kind: input, shape index: {}]   ;;  %s3794_s1 = inlined_call_operand.vmem [shape: s32[32,1], index: 1, kind: input, shape index: {}]   ;;  %s3795_s2 = inlined_call_operand.vmem [shape: f32[128,32], index: 2, kind: input, shape index: {}]   ;;  %s3796_s3 = inlined_call_operand.vmem [shape: f32[8,32], index: 3, kind: input, shape index: {}]   ;;  %s3797_s4 = inlined_call_operand.vmem [shape: f32[32,32], index: 4, kind: input, shape index: {}]   ;;  %s3798_s5 = inlined_call_operand.vmem [shape: f32[1,32], index: 5, kind: input, shape index: {}]   ;;  %s3799_s6 = inlined_call_operand.vmem [shape: f32[32,32], index: 6, kind: input, shape index: {}]   ;;  %s3800_s7 = inlined_call_operand.vmem [shape: f32[1,32], index: 7, kind: input, shape index: {}]   ;;  %s3801_s8 = inlined_call_operand.vmem [shape: f32[32,32], index: 8, kind: input, shape index: {}]   ;;  %s3802_s9 = inlined_call_operand.vmem [shape: f32[1,32], index: 9, kind: input, shape index: {}]   ;;  %s3803_s10 = inlined_call_operand.vmem [shape: f32[32,32], index: 10, kind: input, shape index: {}]   ;;  %s3804_s11 = inlined_call_operand.vmem [shape: f32[1,32], index: 11, kind: input, shape index: {}]   ;;  %s3805_s12 = inlined_call_operand.vmem [shape: f32[1,32], index: 12, kind: input, shape index: {}]   ;;  %s3806_s13 = inlined_call_operand.vmem [shape: f32[1,32], index: 13, kind: input, shape index: {}]   ;;  %s3807_s14 = inlined_call_operand.vmem [shape: f32[32,64], index: 14, kind: input, shape index: {}]   ;;  %s3808_s15 = inlined_call_operand.vmem [shape: f32[1,64], index: 15, kind: input, shape index: {}]   ;;  %s3809_s16 = inlined_call_operand.vmem [shape: f32[64,32], index: 16, kind: input, shape index: {}]   ;;  %s3810_s17 = inlined_call_operand.vmem [shape: f32[1,32], index: 17, kind: input, shape index: {}]   ;;  %s3811_s18 = inlined_call_operand.vmem [shape: f32[1,32], index: 18, kind: input, shape index: {}]   ;;  %s3812_s19 = inlined_call_operand.vmem [shape: f32[1,32], index: 19, kind: input, shape index: {}]   ;;  %s3813_s20 = inlined_call_operand.vmem [shape: f32[32,128], index: 20, kind: input, shape index: {}]   ;;  %s3814_s21 = inlined_call_operand.vmem [shape: f32[1,128], index: 21, kind: input, shape index: {}]   ;;  %s3815_s22 = inlined_call_operand.hbm [shape: f32[2,128], index: 22, kind: output, shape index: {0}]   ;;  %s3816_s23 = inlined_call_operand.hbm [shape: f32[2,32], index: 23, kind: output, shape index: {1}]  }
   0x1   :  { %3822 = sst [smem:[#allocation9_spill]] %s3793_s0 }
   0x2   :  { %3823 = sst [smem:[#allocation10_spill]] %s3794_s1 }
   0x3   :  { %3824 = sst [smem:[#allocation11_spill]] %s3795_s2 }
   0x4   :  { %3825 = sst [smem:[#allocation12_spill]] %s3796_s3 }
   0x5   :  { %3826 = sst [smem:[#allocation13_spill]] %s3797_s4 }
   0x6   :  { %3827 = sst [smem:[#allocation14_spill]] %s3798_s5 }
   0x7   :  { %3828 = sst [smem:[#allocation15_spill]] %s3799_s6 }
   0x8   :  { %3829 = sst [smem:[#allocation16_spill]] %s3800_s7 }
   0x9   :  { %30 = vsyncpa [#allocation4], 0  ;;  %s3830_s24 = sld [smem:[#allocation10_spill]]  ;;  %v3208_v2 = vmov 0   ;;  %s3831_s2 = sld [smem:[#allocation11_spill]] }
   0xa   :  { %3103 = vset.pattern.permute.xlu1 %v3208_v2  ;;  %3102 = vset.pattern.permute.xlu0 %v3208_v2 }
   0xf   :  { %v78_v0 = vld [vmem:[%s3830_s24 + $0x10] sm:$0xff]  ;;  %v76_v1 = vld [vmem:[%s3830_s24] sm:$0xff]  ;;  %v107_v4 = vld [vmem:[%s3831_s2 + $0x8] sm:$0xff] }
  0x10   :  { %v106_v3 = vld [vmem:[%s3831_s2] sm:$0xff]  ;;  %89 = vperm.xlu1 %3103, %v78_v0   ;;  %83 = vperm.xlu0 %3102, %v76_v1   ;;  %v79_v5 = vld [vmem:[%s3830_s24 + $0x18] sm:$0xff]  ;;  %v108_v7 = vld [vmem:[%s3831_s2 + $0x10] sm:$0xff] }
  0x11   :  { %v2992_v6 = vpack.c.bf16 %v107_v4, %v106_v3  ;;  %v109_v8 = vld [vmem:[%s3831_s2 + $0x18] sm:$0xff]  ;;  %v77_v9 = vld [vmem:[%s3830_s24 + $0x8] sm:$0xff]  ;;  %v110_v11 = vld [vmem:[%s3831_s2 + $0x20] sm:$0xff] }
  0x12   :  { %v2996_v10 = vpack.c.bf16 %v109_v8, %v108_v7  ;;  %v111_v12 = vld [vmem:[%s3831_s2 + $0x28] sm:$0xff] }
  0x13   :  { %2993 = vmatprep.subr.bf16.mxu0 %v2992_v6  ;;  %v3000_v13 = vpack.c.bf16 %v111_v12, %v110_v11 }
  0x14   :  { %2995 = vmatpush3.bf16.msra.mxu0 %v2992_v6  ;;  %92 = vperm.xlu1 %3103, %v79_v5  }
  0x15   :  { %86 = vperm.xlu0 %3102, %v77_v9  }
  0x16   :  { %31 = vsyncpa [#allocation6], 0  ;;  %2997 = vmatprep.subr.bf16.mxu0 %v2996_v10  ;;  %v112_v14 = vld [vmem:[%s3831_s2 + $0x30] sm:$0xff]  ;;  %v113_v15 = vld [vmem:[%s3831_s2 + $0x38] sm:$0xff]  ;;  %s3832_s5 = sld [smem:[#allocation13_spill]]  ;;  %v80_v35 = vlaneseq  ;;  %v3209_v39 = vmov 1.0  }
  0x17   :  { %v3004_v16 = vpack.c.bf16 %v113_v15, %v112_v14  ;;  %v114_v17 = vld [vmem:[%s3831_s2 + $0x40] sm:$0xff]  ;;  %v115_v18 = vld [vmem:[%s3831_s2 + $0x48] sm:$0xff]  ;;  %v116_v23 = vld [vmem:[%s3831_s2 + $0x50] sm:$0xff]  ;;  %s3833_s26 = sld [smem:[#allocation15_spill]]  ;;  %vm223_vm4 = vcmask 261120   ;;  %v3210_v63 = vmov 0.0  }
  0x18   :  { %2999 = vmatpush3.bf16.msra.mxu0 %v2996_v10  ;;  %v3008_v22 = vpack.c.bf16 %v115_v18, %v114_v17  ;;  %v117_v24 = vld [vmem:[%s3831_s2 + $0x58] sm:$0xff]  ;;  %v118_v26 = vld [vmem:[%s3831_s2 + $0x60] sm:$0xff]  ;;  %v119_v27 = vld [vmem:[%s3831_s2 + $0x68] sm:$0xff]  ;;  %v81_v36 = vand.u32 127, %v80_v35  ;;  %vm3211_vm5 = vmmov 0   ;;  %s3835_s4 = sld [smem:[#allocation16_spill]] }
  0x19   :  { %3001 = vmatprep.subr.bf16.mxu0 %v3000_v13  ;;  %v3012_v25 = vpack.c.bf16 %v117_v24, %v116_v23  ;;  %v3016_v28 = vpack.c.bf16 %v119_v27, %v118_v26  ;;  %v120_v29 = vld [vmem:[%s3831_s2 + $0x70] sm:$0xff]  ;;  %v121_v30 = vld [vmem:[%s3831_s2 + $0x78] sm:$0xff]  ;;  %v417_v32 = vld [vmem:[%s3801_s8] sm:$0xff]  ;;  %s3834_s2 = sld [smem:[#allocation12_spill]]  ;;  %vm517_vm6 = vcmask 130048   ;;  %s3836_s1 = sld [smem:[#allocation14_spill]] }
  0x1a   :  { %v3020_v31 = vpack.c.bf16 %v121_v30, %v120_v29  ;;  %v418_v33 = vld [vmem:[%s3801_s8 + $0x8] sm:$0xff]  ;;  %v419_v44 = vld [vmem:[%s3801_s8 + $0x10] sm:$0xff]  ;;  %v420_v46 = vld [vmem:[%s3801_s8 + $0x18] sm:$0xff]  ;;  %vm826_vm7 = vcmask 64512   ;;  %vm2274_vm8 = vcmask 523264   ;;  %vm2463_vm9 = vcmask 1041409  }
  0x1b   :  { %v3040_v34 = vpack.c.bf16 %v418_v33, %v417_v32  ;;  %v3044_v47 = vpack.c.bf16 %v420_v46, %v419_v44  ;;  %vm2466_vm10 = vcmask 254976  }
  0x1c   :  { %v212_v19 = vld [vmem:[%s3832_s5] sm:$0xff]  ;;  %v213_v20 = vld [vmem:[%s3832_s5 + $0x8] sm:$0xff]  ;;  %3003 = vmatpush3.bf16.msra.mxu0 %v3000_v13  ;;  %v214_v42 = vld [vmem:[%s3832_s5 + $0x10] sm:$0xff] }
  0x1d   :  { %v3024_v21 = vpack.c.bf16 %v213_v20, %v212_v19  ;;  %3005 = vmatprep.subr.bf16.mxu0 %v3004_v16  ;;  %v215_v43 = vld [vmem:[%s3832_s5 + $0x18] sm:$0xff]  ;;  %v321_v48 = vld [vmem:[%s3833_s26] sm:$0xff]  ;;  %v322_v49 = vld [vmem:[%s3833_s26 + $0x8] sm:$0xff] }
  0x1e   :  { %v3028_v45 = vpack.c.bf16 %v215_v43, %v214_v42  ;;  %v3032_v50 = vpack.c.bf16 %v322_v49, %v321_v48  ;;  %v323_v53 = vld [vmem:[%s3833_s26 + $0x10] sm:$0xff]  ;;  %v324_v54 = vld [vmem:[%s3833_s26 + $0x18] sm:$0xff]  ;;  %v2593_v6 = vld [vmem:[%s3835_s4] ss:$0 sm:$0xff] }
  0x1f   :  { %3025 = vmatprep.subr.bf16.mxu1 %v3024_v21  ;;  %v207_v51 = vld [vmem:[%s3834_s2] sm:$0xff]  ;;  %v3036_v58 = vpack.c.bf16 %v324_v54, %v323_v53 }
  0x20   :  { %3027 = vmatpush3.bf16.msra.mxu1 %v3024_v21  ;;  %3007 = vmatpush3.bf16.msra.mxu0 %v3004_v16  ;;  %v2588_v9 = vld [vmem:[%s3836_s1] ss:$0 sm:$0xff] }
  0x21   :  { %3009 = vmatprep.subr.bf16.mxu0 %v3008_v22  ;;  %3029 = vmatprep.subr.bf16.mxu1 %v3028_v45  ;;  %v2598_v16 = vld [vmem:[%s3802_s9] ss:$0 sm:$0xff]  ;;  %s3212_s9 = smov 112  }
  0x24   :  { %3011 = vmatpush3.bf16.msra.mxu0 %v3008_v22  ;;  %3031 = vmatpush3.bf16.msra.mxu1 %v3028_v45 }
  0x25   :  { %3013 = vmatprep.subr.bf16.mxu0 %v3012_v25  ;;  %3033 = vmatprep.subr.bf16.mxu1 %v3032_v50 }
  0x28   :  { %3015 = vmatpush3.bf16.msra.mxu0 %v3012_v25 }
  0x29   :  { %3017 = vmatprep.subr.bf16.mxu0 %v3016_v28 }
  0x2c   :  { %3019 = vmatpush3.bf16.msra.mxu0 %v3016_v28 }
  0x2d   :  { %3021 = vmatprep.subr.bf16.mxu0 %v3020_v31 }
  0x30   :  { %3023 = vmatpush3.bf16.msra.mxu0 %v3020_v31 }
  0x31   :  { %3041 = vmatprep.subr.bf16.mxu0 %v3040_v34 }
  0x8f   :  { %v90_v37 = vpop.permute.xlu1 %89  ;;  %v84_v38 = vpop.permute.xlu0 %83 }
  0x90   :  { %vm94_vm0 = vcmp.eq.s32.totalorder %v81_v36, %v84_v38  ;;  %vm96_vm1 = vcmp.eq.s32.totalorder %v81_v36, %v90_v37 }
  0x91   :  { %2797 = vmatprep.mubr.msk.f32.mxu0 %vm94_vm0, %v3209_v39 }
  0x93   :  { %v93_v41 = vpop.permute.xlu1 %92 }
  0x94   :  { %v87_v40 = vpop.permute.xlu0 %86  ;;  %vm97_vm3 = vcmp.eq.s32.totalorder %v81_v36, %v93_v41 }
  0x95   :  { %vm95_vm2 = vcmp.eq.s32.totalorder %v81_v36, %v87_v40 }
  0x96   :  { %2798 = vmatmul.mubr.msk.f32.vlgmr.msra.gmra.mrb[0].mxu0 %vm95_vm2, %v3209_v39 }
  0x97   :  { %2800 = vmatprep.mubr.msk.f32.mxu0 %vm96_vm1, %v3209_v39  ;;  %3043 = vmatpush3.bf16.msra.mxu0 %v3040_v34 }
  0x98   :  { %3045 = vmatprep.subr.bf16.mxu0 %v3044_v47 }
  0x9a   :  { %2801 = vmatmul.mubr.msk.f32.gmra.mrb[2].mxu0 %vm97_vm3, %v3209_v39 }
  0x9b   :  { %3047 = vmatpush3.bf16.msra.mxu0 %v3044_v47 }
  0x9c   :  { %2855 = vmatprep.subr.mxu0 %v3210_v63 }
 0x169   :  { %v2799_v52 = vpop.f32.mrb[0].mxu0 }
 0x16a   :  { %v188_v55 = vpop.f32.mrb[1].mxu0  ;;  %v3437_v57 = vadd.f32 %v2799_v52, %v207_v51 }
 0x16b   :  { %v3435_v56 = vadd.f32 %v207_v51, %v188_v55 }
 0x16d   :  { %v2802_v59 = vpop.f32.mrb[2].mxu0  ;;  %2811 = vmatprep.mubr.msk.f32.mxu1 %vm223_vm4, %v3435_v56  ;;  %2839 = vmatprep.mubr.msk.f32.mxu0 %vm223_vm4, %v3435_v56 }
 0x16e   :  { %v198_v60 = vpop.f32.mrb[3].mxu0  ;;  %2812 = vmatmul.mubr.msk.f32.vlgmr.msra.gmra.mrb[0].mxu1 %vm223_vm4, %v3437_v57  ;;  %2840 = vmatmul.mubr.msk.f32.vlgmr.msra.gmra.mrb[4].mxu0 %vm223_vm4, %v3437_v57  ;;  %v3449_v62 = vadd.f32 %v2802_v59, %v207_v51 }
 0x16f   :  { %v3447_v61 = vadd.f32 %v207_v51, %v198_v60  ;;  %3035 = vmatpush3.bf16.msra.mxu1 %v3032_v50  ;;  %2857 = vmatprep.mubr.msk.f32.mxu0 %vm3211_vm5, %v3210_v63 }
 0x170   :  { %3037 = vmatprep.subr.bf16.mxu1 %v3036_v58 }
 0x171   :  { %2814 = vmatprep.mubr.msk.f32.mxu1 %vm223_vm4, %v3447_v61 }
 0x172   :  { %2815 = vmatmul.mubr.msk.f32.gmra.mrb[2].mxu1 %vm223_vm4, %v3449_v62 }
 0x173   :  { %3039 = vmatpush3.bf16.msra.mxu1 %v3036_v58  ;;  %2825 = vmatprep.mubr.msk.f32.mxu1 %vm223_vm4, %v3435_v56 }
 0x174   :  { %3086 = vmatprep.subr.bf16.mxu1 %v3040_v34 }
 0x176   :  { %2826 = vmatmul.mubr.msk.f32.vlgmr.msra.gmra.mrb[4].mxu1 %vm223_vm4, %v3437_v57 }
 0x177   :  { %2828 = vmatprep.mubr.msk.f32.mxu1 %vm223_vm4, %v3447_v61  ;;  %3088 = vmatpush3.bf16.msra.mxu1 %v3040_v34 }
 0x178   :  { %3087 = vmatprep.subr.bf16.mxu1 %v3044_v47 }
 0x17a   :  { %2829 = vmatmul.mubr.msk.f32.gmra.mrb[6].mxu1 %vm223_vm4, %v3449_v62 }
 0x17b   :  { %3089 = vmatpush3.bf16.msra.mxu1 %v3044_v47  ;;  %2842 = vmatprep.mubr.msk.f32.mxu1 %vm223_vm4, %v3447_v61 }
 0x17c   :  { %2845 = vmatprep.subr.mxu1 %v3210_v63 }
 0x17e   :  { %2843 = vmatmul.mubr.msk.f32.vlgmr.msra.gmra.mrb[8].mxu1 %vm223_vm4, %v3449_v62 }
 0x17f   :  { %2847 = vmatprep.mubr.msk.f32.mxu1 %vm3211_vm5, %v3210_v63 }
 0x241   :  { %v2813_v0 = vpop.f32.mrb[0].mxu1  ;;  %v2841_v1 = vpop.f32.mrb[4].mxu0 }
 0x242   :  { %v302_v2 = vpop.f32.mrb[1].mxu1  ;;  %v494_v3 = vpop.f32.mrb[5].mxu0  ;;  %v308_v18 = vadd.f32 %v2813_v0, %v2588_v9  ;;  %v3521_v26 = vadd.f32 %v2841_v1, %v2598_v16 }
 0x243   :  { %v3480_v12 = vadd.f32 %v2588_v9, %v302_v2  ;;  %v3503_v22 = vadd.f32 %v2598_v16, %v494_v3 }
 0x245   :  { %v2816_v4 = vpop.f32.mrb[2].mxu1 }
 0x246   :  { %v312_v5 = vpop.f32.mrb[3].mxu1  ;;  %v3516_v25 = vadd.f32 %v2816_v4, %v2588_v9 }
 0x247   :  { %v3496_v19 = vadd.f32 %v2588_v9, %v312_v5 }
 0x249   :  { %v2827_v7 = vpop.f32.mrb[4].mxu1 }
 0x24a   :  { %v398_v8 = vpop.f32.mrb[5].mxu1  ;;  %v3483_v14 = vadd.f32 %v2827_v7, %v2593_v6 }
 0x24b   :  { %v399_v10 = vadd.f32 %v2593_v6, %v398_v8 }
 0x24d   :  { %v2830_v11 = vpop.f32.mrb[6].mxu1  ;;  %2846 = vmatpush3.xpose.msk.msra.mxu1 %vm517_vm6, %v399_v10 }
 0x24e   :  { %v408_v13 = vpop.f32.mrb[7].mxu1  ;;  %2850 = vmatprep.subr.mxu1 %v3210_v63  ;;  %v3505_v23 = vadd.f32 %v2830_v11, %v2593_v6 }
 0x24f   :  { %v3485_v15 = vadd.f32 %v2593_v6, %v408_v13 }
 0x250   :  { %2848 = vmatmul.mubr.msk.f32.vlgmr.msra.gmra.mrb[10].mxu1 %vm517_vm6, %v3480_v12 }
 0x251   :  { %v2844_v17 = vpop.f32.mrb[8].mxu1  ;;  %2851 = vmatpush3.xpose.msk.msra.mxu1 %vm517_vm6, %v3483_v14  ;;  %2856 = vmatpush3.xpose.msk.msra.mxu0 %vm517_vm6, %v3485_v15 }
 0x252   :  { %v3498_v20 = vadd.f32 %v2844_v17, %v2598_v16  ;;  %v504_v21 = vpop.f32.mrb[9].mxu1  ;;  %2852 = vmatprep.mubr.msk.f32.mxu1 %vm3211_vm5, %v3210_v63  ;;  %2860 = vmatprep.subr.mxu1 %v3210_v63 }
 0x253   :  { %v3507_v24 = vadd.f32 %v2598_v16, %v504_v21  ;;  %2865 = vmatprep.subr.mxu0 %v3210_v63 }
 0x254   :  { %2853 = vmatmul.mubr.msk.f32.vlgmr.msra.gmra.mrb[12].mxu1 %vm517_vm6, %v308_v18  ;;  %2858 = vmatmul.mubr.msk.f32.vlgmr.msra.gmra.mrb[6].mxu0 %vm517_vm6, %v3496_v19 }
 0x255   :  { %2861 = vmatpush3.xpose.msk.msra.mxu1 %vm517_vm6, %v3505_v23  ;;  %2866 = vmatpush3.msra.mxu0 %v3503_v22 }
 0x256   :  { %2862 = vmatprep.mubr.msk.f32.mxu1 %vm3211_vm5, %v3210_v63  ;;  %2870 = vmatprep.subr.mxu1 %v3210_v63 }
 0x257   :  { %2867 = vmatprep.mubr.msk.f32.mxu0 %vm3211_vm5, %v3210_v63  ;;  %2875 = vmatprep.subr.mxu0 %v3210_v63 }
 0x258   :  { %2863 = vmatmul.mubr.msk.f32.vlgmr.msra.gmra.mrb[14].mxu1 %vm517_vm6, %v3516_v25 }
 0x259   :  { %2871 = vmatpush3.msra.mxu1 %v3521_v26  ;;  %2872 = vmatprep.mubr.msk.f32.mxu1 %vm3211_vm5, %v3210_v63 }
 0x25a   :  { %2880 = vmatprep.subr.mxu1 %v3210_v63 }
 0x323   :  { %v590_v27 = vpop.f32.mrb[10].mxu1 }
 0x324   :  { %v822_v28 = vmul.f32 0.25, %v590_v27  ;;  %v2849_v29 = vpop.f32.mrb[11].mxu1 }
 0x326   :  { %v827_v30 = vsel %vm826_vm7, %v822_v28, -inf }
 0x327   :  { %828 = vmax.xlane.f32.xlu0 %v827_v30  ;;  %v666_v31 = vpop.f32.mrb[12].mxu1  ;;  %v742_v32 = vpop.f32.mrb[6].mxu0 }
 0x328   :  { %v823_v33 = vmul.f32 0.25, %v666_v31  ;;  %v824_v34 = vmul.f32 0.25, %v742_v32  ;;  %v2854_v35 = vpop.f32.mrb[13].mxu1  ;;  %v2859_v36 = vpop.f32.mrb[7].mxu0 }
 0x32a   :  { %v830_v37 = vsel %vm826_vm7, %v823_v33, -inf  ;;  %v833_v38 = vsel %vm826_vm7, %v824_v34, -inf }
 0x32b   :  { %831 = vmax.xlane.f32.xlu1 %v830_v37  ;;  %v818_v39 = vpop.f32.mrb[14].mxu1  ;;  %834 = vmax.xlane.f32.xlu0 %v833_v38 }
 0x32c   :  { %v825_v40 = vmul.f32 0.25, %v818_v39  ;;  %v2864_v41 = vpop.f32.mrb[15].mxu1 }
 0x32e   :  { %v836_v42 = vsel %vm826_vm7, %v825_v40, -inf }
 0x32f   :  { %837 = vmax.xlane.f32.xlu0 %v836_v42 }
 0x33c   :  { %1165 = vrot.lane.b32.xlu1 %v399_v10, %s3212_s9 }
 0x3b4   :  { %v829_v43 = vpop.xlane.xlu0 %828 }
 0x3b5   :  { %v839_v44 = vsub.f32 %v822_v28, %v829_v43 }
 0x3b7   :  { %v843_v45 = vmul.f32 1.442695, %v839_v44 }
 0x3b8   :  { %v832_v46 = vpop.xlane.xlu1 %831  ;;  %v835_v53 = vpop.xlane.xlu0 %834 }
 0x3b9   :  { %3104 = vpow2.f32 %v843_v45  ;;  %v840_v47 = vsub.f32 %v823_v33, %v832_v46  ;;  %v841_v55 = vsub.f32 %v824_v34, %v835_v53 }
 0x3bb   :  { %v845_v48 = vmul.f32 1.442695, %v840_v47  ;;  %v847_v59 = vmul.f32 1.442695, %v841_v55 }
 0x3bc   :  { %v838_v54 = vpop.xlane.xlu0 %837  ;;  %v1166_v4 = vpop.permute.xlu1 %1165 }
 0x3bd   :  { %3106 = vpow2.f32 %v845_v48  ;;  %v842_v58 = vsub.f32 %v825_v40, %v838_v54 }
 0x3be   :  { %3108 = vpow2.f32 %v847_v59 }
 0x3bf   :  { %v849_v60 = vmul.f32 1.442695, %v842_v58 }
 0x3c1   :  { %3110 = vpow2.f32 %v849_v60 }
 0x3c3   :  { %v3105_v49 = vpop.eup %3104 }
 0x3c4   :  { %v851_v50 = vsel %vm826_vm7, %v3105_v49, 0.0 }
 0x3c5   :  { %852 = vadd.xlane.f32.xlu1 %v851_v50 }
 0x3c7   :  { %v3107_v51 = vpop.eup %3106 }
 0x3c8   :  { %v854_v52 = vsel %vm826_vm7, %v3107_v51, 0.0  ;;  %v3109_v0 = vpop.eup %3108 }
 0x3c9   :  { %855 = vadd.xlane.f32.xlu0 %v854_v52  ;;  %v857_v2 = vsel %vm826_vm7, %v3109_v0, 0.0 }
 0x3cb   :  { %v3111_v1 = vpop.eup %3110 }
 0x3cc   :  { %v860_v3 = vsel %vm826_vm7, %v3111_v1, 0.0 }
 0x3d6   :  { %1163 = vrot.lane.b32.xlu1 %v3480_v12, %s3212_s9 }
 0x3da   :  { %1241 = vrot.lane.b32.xlu1 %v308_v18, %s3212_s9 }
 0x3df   :  { %1243 = vrot.lane.b32.xlu0 %v3483_v14, %s3212_s9 }
 0x3fe   :  { %858 = vadd.xlane.f32.xlu1 %v857_v2  ;;  %861 = vadd.xlane.f32.xlu0 %v860_v3 }
 0x40f   :  { %1399 = vrot.lane.b32.xlu1 %v3505_v23, %s3212_s9 }
 0x413   :  { %1397 = vrot.lane.b32.xlu1 %v3516_v25, %s3212_s9 }
 0x414   :  { %1321 = vrot.lane.b32.xlu0 %v3485_v15, %s3212_s9 }
 0x418   :  { %1319 = vrot.lane.b32.xlu0 %v3496_v19, %s3212_s9 }
 0x452   :  { %v853_v5 = vpop.xlane.xlu1 %852 }
 0x453   :  { %3112 = vrcp.f32 %v853_v5 }
 0x456   :  { %v856_v6 = vpop.xlane.xlu0 %855  ;;  %v1164_v11 = vpop.permute.xlu1 %1163 }
 0x457   :  { %3114 = vrcp.f32 %v856_v6 }
 0x45a   :  { %v1242_v12 = vpop.permute.xlu1 %1241  ;;  %v1244_v13 = vpop.permute.xlu0 %1243 }
 0x45d   :  { %v3113_v7 = vpop.eup %3112 }
 0x45e   :  { %v867_v8 = vmul.f32 %v3113_v7, %v3105_v49 }
 0x460   :  { %2868 = vmatmul.mubr.msk.f32.vlgmr.msra.gmra.mrb[8].mxu0 %vm826_vm7, %v867_v8 }
 0x461   :  { %v3115_v9 = vpop.eup %3114  ;;  %2876 = vmatpush3.msra.mxu0 %v3507_v24  ;;  %2877 = vmatprep.mubr.msk.f32.mxu0 %vm3211_vm5, %v3210_v63 }
 0x462   :  { %v868_v10 = vmul.f32 %v3115_v9, %v3107_v51  ;;  %2885 = vmatprep.subr.mxu0 %v3210_v63 }
 0x464   :  { %2873 = vmatmul.mubr.msk.f32.vlgmr.msra.gmra.mrb[16].mxu1 %vm826_vm7, %v868_v10 }
 0x465   :  { %2881 = vmatpush3.msra.mxu1 %v3498_v20  ;;  %2882 = vmatprep.mubr.msk.f32.mxu1 %vm3211_vm5, %v3210_v63 }
 0x466   :  { %2890 = vmatprep.subr.mxu1 %v3210_v63 }
 0x48b   :  { %v859_v14 = vpop.xlane.xlu1 %858  ;;  %v862_v15 = vpop.xlane.xlu0 %861 }
 0x48c   :  { %3116 = vrcp.f32 %v859_v14 }
 0x48d   :  { %3118 = vrcp.f32 %v862_v15 }
 0x48f   :  { %v1322_v21 = vpop.permute.xlu0 %1321  ;;  %v1400_v23 = vpop.permute.xlu1 %1399 }
 0x493   :  { %v1320_v25 = vpop.permute.xlu0 %1319  ;;  %v1398_v27 = vpop.permute.xlu1 %1397 }
 0x496   :  { %v3117_v16 = vpop.eup %3116 }
 0x497   :  { %v3119_v17 = vpop.eup %3118  ;;  %v869_v18 = vmul.f32 %v3117_v16, %v3109_v0 }
 0x498   :  { %v870_v19 = vmul.f32 %v3119_v17, %v3111_v1 }
 0x499   :  { %2878 = vmatmul.mubr.msk.f32.vlgmr.msra.gmra.mrb[10].mxu0 %vm826_vm7, %v869_v18  ;;  %v515_v18 = vld [vmem:[%s3803_s10 + $0x10] sm:$0xff] }
 0x49a   :  { %2883 = vmatmul.mubr.msk.f32.vlgmr.msra.gmra.mrb[18].mxu1 %vm826_vm7, %v870_v19  ;;  %2886 = vmatpush3.xpose.msk.msra.mxu0 %vm517_vm6, %v1166_v4 }
 0x49b   :  { %2891 = vmatpush3.xpose.msk.msra.mxu1 %vm517_vm6, %v1244_v13  ;;  %2887 = vmatprep.mubr.msk.f32.mxu0 %vm3211_vm5, %v3210_v63 }
 0x49c   :  { %2892 = vmatprep.mubr.msk.f32.mxu1 %vm3211_vm5, %v3210_v63  ;;  %2895 = vmatprep.subr.mxu0 %v3210_v63 }
 0x49d   :  { %2900 = vmatprep.subr.mxu1 %v3210_v63  ;;  %2888 = vmatmul.mubr.msk.f32.vlgmr.msra.gmra.mrb[12].mxu0 %vm517_vm6, %v1164_v11 }
 0x49e   :  { %2893 = vmatmul.mubr.msk.f32.vlgmr.msra.gmra.mrb[20].mxu1 %vm517_vm6, %v1242_v12  ;;  %2896 = vmatpush3.xpose.msk.msra.mxu0 %vm517_vm6, %v1322_v21 }
 0x49f   :  { %2901 = vmatpush3.xpose.msk.msra.mxu1 %vm517_vm6, %v1400_v23  ;;  %2897 = vmatprep.mubr.msk.f32.mxu0 %vm3211_vm5, %v3210_v63 }
 0x4a0   :  { %2902 = vmatprep.mubr.msk.f32.mxu1 %vm3211_vm5, %v3210_v63  ;;  %2905 = vmatprep.subr.mxu0 %v3210_v63 }
 0x4a1   :  { %2898 = vmatmul.mubr.msk.f32.vlgmr.msra.gmra.mrb[14].mxu0 %vm517_vm6, %v1320_v25  ;;  %2910 = vmatprep.subr.mxu1 %v3210_v63 }
 0x4a2   :  { %2903 = vmatmul.mubr.msk.f32.vlgmr.msra.gmra.mrb[22].mxu1 %vm517_vm6, %v1398_v27  ;;  %2907 = vmatprep.mubr.msk.f32.mxu0 %vm3211_vm5, %v3210_v63 }
 0x4a3   :  { %2912 = vmatprep.mubr.msk.f32.mxu1 %vm3211_vm5, %v3210_v63 }
 0x533   :  { %v3590_v28 = vpop.f32.mrb[8].mxu0 }
 0x534   :  { %v2869_v29 = vpop.f32.mrb[9].mxu0 }
 0x537   :  { %v3592_v30 = vpop.f32.mrb[16].mxu1 }
 0x538   :  { %v2874_v31 = vpop.f32.mrb[17].mxu1 }
 0x56c   :  { %v3594_v32 = vpop.f32.mrb[10].mxu0 }
 0x56d   :  { %v3596_v33 = vpop.f32.mrb[18].mxu1  ;;  %v2879_v34 = vpop.f32.mrb[11].mxu0 }
 0x56e   :  { %v2884_v35 = vpop.f32.mrb[19].mxu1 }
 0x570   :  { %v1237_v36 = vpop.f32.mrb[12].mxu0 }
 0x571   :  { %v1475_v37 = vmul.f32 0.25, %v1237_v36  ;;  %v1315_v38 = vpop.f32.mrb[20].mxu1  ;;  %v2889_v39 = vpop.f32.mrb[13].mxu0  ;;  %v513_v36 = vld [vmem:[%s3803_s10] sm:$0xff] }
 0x572   :  { %v1476_v40 = vmul.f32 0.25, %v1315_v38  ;;  %v2894_v41 = vpop.f32.mrb[21].mxu1 }
 0x573   :  { %v1479_v42 = vsel %vm826_vm7, %v1475_v37, -inf }
 0x574   :  { %v1482_v43 = vsel %vm826_vm7, %v1476_v40, -inf  ;;  %1480 = vmax.xlane.f32.xlu0 %v1479_v42  ;;  %v1393_v44 = vpop.f32.mrb[14].mxu0 }
 0x575   :  { %1483 = vmax.xlane.f32.xlu1 %v1482_v43  ;;  %v1471_v45 = vpop.f32.mrb[22].mxu1  ;;  %v1477_v46 = vmul.f32 0.25, %v1393_v44  ;;  %v2899_v47 = vpop.f32.mrb[15].mxu0 }
 0x576   :  { %v2904_v48 = vpop.f32.mrb[23].mxu1  ;;  %v1478_v49 = vmul.f32 0.25, %v1471_v45  ;;  %v2635_v47 = vld [vmem:[%s3804_s11] ss:$0 sm:$0xff] }
 0x577   :  { %v1485_v50 = vsel %vm826_vm7, %v1477_v46, -inf }
 0x578   :  { %1486 = vmax.xlane.f32.xlu0 %v1485_v50  ;;  %v1488_v51 = vsel %vm826_vm7, %v1478_v49, -inf }
 0x57c   :  { %1489 = vmax.xlane.f32.xlu0 %v1488_v51 }
 0x586   :  { %1524 = vrot.lane.b32.xlu1 %v3503_v22, %s3212_s9 }
 0x601   :  { %v1481_v52 = vpop.xlane.xlu0 %1480 }
 0x602   :  { %v1484_v53 = vpop.xlane.xlu1 %1483  ;;  %v1491_v54 = vsub.f32 %v1475_v37, %v1481_v52  ;;  %v514_v37 = vld [vmem:[%s3803_s10 + $0x8] sm:$0xff] }
 0x603   :  { %v1492_v55 = vsub.f32 %v1476_v40, %v1484_v53  ;;  %v3052_v38 = vpack.c.bf16 %v514_v37, %v513_v36 }
 0x604   :  { %v1495_v58 = vmul.f32 1.442695, %v1491_v54 }
 0x605   :  { %v1497_v59 = vmul.f32 1.442695, %v1492_v55  ;;  %v1487_v60 = vpop.xlane.xlu0 %1486 }
 0x606   :  { %3120 = vpow2.f32 %v1495_v58  ;;  %v1525_v0 = vpop.permute.xlu1 %1524  ;;  %v1493_v1 = vsub.f32 %v1477_v46, %v1487_v60 }
 0x607   :  { %3122 = vpow2.f32 %v1497_v59  ;;  %2906 = vmatpush3.msra.mxu0 %v1525_v0 }
 0x608   :  { %v1499_v2 = vmul.f32 1.442695, %v1493_v1  ;;  %2915 = vmatprep.subr.mxu0 %v3210_v63 }
 0x609   :  { %v1490_v3 = vpop.xlane.xlu0 %1489 }
 0x60a   :  { %3124 = vpow2.f32 %v1499_v2  ;;  %v1494_v4 = vsub.f32 %v1478_v49, %v1490_v3 }
 0x60c   :  { %v1501_v5 = vmul.f32 1.442695, %v1494_v4 }
 0x60e   :  { %3126 = vpow2.f32 %v1501_v5 }
 0x610   :  { %v3121_v22 = vpop.eup %3120 }
 0x611   :  { %v3123_v6 = vpop.eup %3122  ;;  %v1503_v7 = vsel %vm826_vm7, %v3121_v22, 0.0 }
 0x612   :  { %1504 = vadd.xlane.f32.xlu1 %v1503_v7  ;;  %v1506_v8 = vsel %vm826_vm7, %v3123_v6, 0.0 }
 0x613   :  { %1507 = vadd.xlane.f32.xlu0 %v1506_v8 }
 0x614   :  { %v3125_v9 = vpop.eup %3124 }
 0x615   :  { %v1509_v10 = vsel %vm826_vm7, %v3125_v9, 0.0 }
 0x616   :  { %1510 = vadd.xlane.f32.xlu1 %v1509_v10 }
 0x618   :  { %v3127_v11 = vpop.eup %3126 }
 0x619   :  { %v1512_v12 = vsel %vm826_vm7, %v3127_v11, 0.0 }
 0x61a   :  { %1513 = vadd.xlane.f32.xlu0 %v1512_v12 }
 0x627   :  { %1678 = vrot.lane.b32.xlu1 %v3507_v24, %s3212_s9 }
 0x62b   :  { %1755 = vrot.lane.b32.xlu1 %v3498_v20, %s3212_s9  ;;  %v516_v20 = vld [vmem:[%s3803_s10 + $0x18] sm:$0xff]  ;;  %s3837_s10 = sld [smem:[#allocation9_spill]] }
 0x62c   :  { %v3048_v25 = vpack.c.bf16 %v516_v20, %v515_v18  ;;  %v2117_v18 = vld [vmem:[%s3807_s14 + $0x10] sm:$0xff]  ;;  %v2118_v20 = vld [vmem:[%s3807_s14 + $0x18] sm:$0xff] }
 0x630   :  { %1601 = vrot.lane.b32.xlu0 %v3521_v26, %s3212_s9 }
 0x631   :  { %s2454_s3 = ssub.f32 1.0, %s3837_s10 }
 0x69f   :  { %v1505_v13 = vpop.xlane.xlu1 %1504 }
 0x6a0   :  { %3128 = vrcp.f32 %v1505_v13  ;;  %v1508_v14 = vpop.xlane.xlu0 %1507 }
 0x6a1   :  { %3130 = vrcp.f32 %v1508_v14 }
 0x6a3   :  { %v1511_v15 = vpop.xlane.xlu1 %1510 }
 0x6a4   :  { %3132 = vrcp.f32 %v1511_v15  ;;  %v2115_v15 = vld [vmem:[%s3807_s14] sm:$0xff] }
 0x6a7   :  { %v1514_v16 = vpop.xlane.xlu0 %1513  ;;  %v1679_v17 = vpop.permute.xlu1 %1678 }
 0x6a8   :  { %3134 = vrcp.f32 %v1514_v16  ;;  %v2116_v16 = vld [vmem:[%s3807_s14 + $0x8] sm:$0xff] }
 0x6aa   :  { %v3129_v24 = vpop.eup %3128 }
 0x6ab   :  { %v3131_v19 = vpop.eup %3130  ;;  %v1519_v26 = vmul.f32 %v3129_v24, %v3121_v22  ;;  %v1602_v21 = vpop.permute.xlu0 %1601  ;;  %v3060_v24 = vpack.c.bf16 %v2118_v20, %v2117_v18 }
 0x6ac   :  { %v1520_v23 = vmul.f32 %v3131_v19, %v3123_v6  ;;  %2911 = vmatpush3.msra.mxu1 %v1602_v21  ;;  %v1756_v29 = vpop.permute.xlu1 %1755 }
 0x6ad   :  { %2908 = vmatmul.mubr.msk.f32.vlgmr.msra.gmra.mrb[16].mxu0 %vm826_vm7, %v1519_v26  ;;  %2920 = vmatprep.subr.mxu1 %v3210_v63 }
 0x6ae   :  { %v3133_v27 = vpop.eup %3132  ;;  %2913 = vmatmul.mubr.msk.f32.vlgmr.msra.gmra.mrb[24].mxu1 %vm826_vm7, %v1520_v23  ;;  %2916 = vmatpush3.msra.mxu0 %v1679_v17  ;;  %v3056_v17 = vpack.c.bf16 %v2116_v16, %v2115_v15 }
 0x6af   :  { %v1521_v31 = vmul.f32 %v3133_v27, %v3125_v9  ;;  %2921 = vmatpush3.msra.mxu1 %v1756_v29  ;;  %2917 = vmatprep.mubr.msk.f32.mxu0 %vm3211_vm5, %v3210_v63 }
 0x6b0   :  { %2922 = vmatprep.mubr.msk.f32.mxu1 %vm3211_vm5, %v3210_v63  ;;  %3049 = vmatprep.subr.bf16.mxu0 %v3048_v25 }
 0x6b1   :  { %2918 = vmatmul.mubr.msk.f32.vlgmr.msra.gmra.mrb[18].mxu0 %vm826_vm7, %v1521_v31  ;;  %3057 = vmatprep.subr.bf16.mxu1 %v3056_v17 }
 0x6b2   :  { %v3135_v34 = vpop.eup %3134  ;;  %3051 = vmatpush3.bf16.msra.mxu0 %v3048_v25 }
 0x6b3   :  { %v1522_v35 = vmul.f32 %v3135_v34, %v3127_v11  ;;  %3053 = vmatprep.subr.bf16.mxu0 %v3052_v38 }
 0x6b5   :  { %2923 = vmatmul.mubr.msk.f32.vlgmr.msra.gmra.mrb[26].mxu1 %vm826_vm7, %v1522_v35 }
 0x6b6   :  { %3059 = vmatpush3.bf16.msra.mxu1 %v3056_v17 }
 0x6b7   :  { %3061 = vmatprep.subr.bf16.mxu1 %v3060_v24 }
 0x6ba   :  { %3063 = vmatpush3.bf16.msra.mxu1 %v3060_v24 }
 0x780   :  { %v1596_v39 = vpop.f32.mrb[16].mxu0 }
 0x781   :  { %v1673_v40 = vpop.f32.mrb[24].mxu1  ;;  %v2909_v41 = vpop.f32.mrb[17].mxu0  ;;  %2929 = vmatprep.mubr.msk.f32.mxu0 %vm517_vm6, %v1596_v39  ;;  %v2636_v39 = vld [vmem:[%s3805_s12] ss:$0 sm:$0xff] }
 0x782   :  { %v2914_v42 = vpop.f32.mrb[25].mxu1  ;;  %2930 = vmatmul.mubr.msk.f32.vlgmr.msra.gmra.mrb[20].mxu0 %vm517_vm6, %v1673_v40 }
 0x783   :  { %3055 = vmatpush3.bf16.msra.mxu0 %v3052_v38 }
 0x784   :  { %v1750_v43 = vpop.f32.mrb[18].mxu0 }
 0x785   :  { %v2919_v44 = vpop.f32.mrb[19].mxu0  ;;  %2932 = vmatprep.mubr.msk.f32.mxu0 %vm517_vm6, %v1750_v43  ;;  %v2637_v43 = vld [vmem:[%s3806_s13] ss:$0 sm:$0xff] }
 0x788   :  { %v1827_v45 = vpop.f32.mrb[26].mxu1 }
 0x789   :  { %v2924_v46 = vpop.f32.mrb[27].mxu1  ;;  %2933 = vmatmul.mubr.msk.f32.gmra.mrb[22].mxu0 %vm517_vm6, %v1827_v45 }
 0x78a   :  { %2939 = vmatprep.mubr.msk.f32.mxu0 %vm517_vm6, %v3590_v28 }
 0x78d   :  { %2940 = vmatmul.mubr.msk.f32.vlgmr.msra.gmra.mrb[20].mxu0 %vm517_vm6, %v3592_v30 }
 0x78e   :  { %2942 = vmatprep.mubr.msk.f32.mxu0 %vm517_vm6, %v3594_v32 }
 0x791   :  { %2943 = vmatmul.mubr.msk.f32.gmra.mrb[22].mxu0 %vm517_vm6, %v3596_v33 }
 0x792   :  { %2989 = vmatprep.mubr.msk.f32.mxu0 %vm3211_vm5, %v3210_v63 }
 0x860   :  { %v2941_v48 = vpop.f32.mrb[20].mxu0 }
 0x861   :  { %v2033_v49 = vadd.f32 %v2941_v48, %v2635_v47  ;;  %v2006_v50 = vpop.f32.mrb[21].mxu0 }
 0x862   :  { %v2032_v28 = vadd.f32 %v2635_v47, %v2006_v50 }
 0x863   :  { %v2037_v51 = vadd.f32 %v2033_v49, %v3437_v57 }
 0x864   :  { %v2944_v30 = vpop.f32.mrb[22].mxu0  ;;  %v2036_v52 = vadd.f32 %v2032_v28, %v3435_v56 }
 0x865   :  { %v2016_v32 = vpop.f32.mrb[23].mxu0  ;;  %v2045_v53 = vsel %vm223_vm4, %v2037_v51, 0.0  ;;  %v2035_v33 = vadd.f32 %v2944_v30, %v2635_v47 }
 0x866   :  { %v2034_v54 = vadd.f32 %v2635_v47, %v2016_v32  ;;  %2046 = vadd.xlane.f32.xlu1 %v2045_v53  ;;  %v2042_v63 = vsel %vm223_vm4, %v2036_v52, 0.0  ;;  %v2259_v53 = vld [vmem:[%s3809_s16] sm:$0xff] }
 0x867   :  { %2043 = vadd.xlane.f32.xlu0 %v2042_v63  ;;  %v2039_v59 = vadd.f32 %v2035_v33, %v3449_v62  ;;  %v2260_v33 = vld [vmem:[%s3809_s16 + $0x8] sm:$0xff]  ;;  %v2261_v63 = vld [vmem:[%s3809_s16 + $0x10] sm:$0xff] }
 0x868   :  { %v2038_v55 = vadd.f32 %v2034_v54, %v3447_v61  ;;  %v3064_v54 = vpack.c.bf16 %v2260_v33, %v2259_v53 }
 0x869   :  { %v2051_v57 = vsel %vm223_vm4, %v2039_v59, 0.0 }
 0x86a   :  { %v2048_v58 = vsel %vm223_vm4, %v2038_v55, 0.0  ;;  %3065 = vmatprep.subr.bf16.mxu1 %v3064_v54 }
 0x86b   :  { %2049 = vadd.xlane.f32.xlu0 %v2048_v58 }
 0x86f   :  { %2052 = vadd.xlane.f32.xlu0 %v2051_v57  ;;  %v2264_v57 = vld [vmem:[%s3809_s16 + $0x28] sm:$0xff] }
 0x8f3   :  { %v2047_v56 = vpop.xlane.xlu1 %2046 }
 0x8f4   :  { %v2056_v60 = vmul.f32 0.03125, %v2047_v56  ;;  %v2044_v0 = vpop.xlane.xlu0 %2043 }
 0x8f5   :  { %v2055_v1 = vmul.f32 0.03125, %v2044_v0  ;;  %v2266_v0 = vld [vmem:[%s3809_s16 + $0x38] sm:$0xff] }
 0x8f6   :  { %v2060_v2 = vsub.f32 %v2037_v51, %v2056_v60  ;;  %v2265_v60 = vld [vmem:[%s3809_s16 + $0x30] sm:$0xff] }
 0x8f7   :  { %v2059_v3 = vsub.f32 %v2036_v52, %v2055_v1  ;;  %v3076_v1 = vpack.c.bf16 %v2266_v0, %v2265_v60 }
 0x8f8   :  { %v2050_v4 = vpop.xlane.xlu0 %2049  ;;  %v2064_v5 = vmul.f32 %v2060_v2, %v2060_v2 }
 0x8f9   :  { %v2057_v22 = vmul.f32 0.03125, %v2050_v4  ;;  %v2063_v6 = vmul.f32 %v2059_v3, %v2059_v3 }
 0x8fa   :  { %v2070_v61 = vsel %vm223_vm4, %v2064_v5, 0.0 }
 0x8fb   :  { %v2061_v7 = vsub.f32 %v2038_v55, %v2057_v22  ;;  %2071 = vadd.xlane.f32.xlu0 %v2070_v61  ;;  %v2067_v62 = vsel %vm223_vm4, %v2063_v6, 0.0  ;;  %v2262_v55 = vld [vmem:[%s3809_s16 + $0x18] sm:$0xff] }
 0x8fc   :  { %2068 = vadd.xlane.f32.xlu1 %v2067_v62  ;;  %v2053_v8 = vpop.xlane.xlu0 %2052  ;;  %v3068_v58 = vpack.c.bf16 %v2262_v55, %v2261_v63 }
 0x8fd   :  { %v2058_v9 = vmul.f32 0.03125, %v2053_v8  ;;  %v2065_v10 = vmul.f32 %v2061_v7, %v2061_v7 }
 0x8ff   :  { %v2062_v11 = vsub.f32 %v2039_v59, %v2058_v9  ;;  %v2073_v12 = vsel %vm223_vm4, %v2065_v10, 0.0  ;;  %v2263_v59 = vld [vmem:[%s3809_s16 + $0x20] sm:$0xff] }
 0x900   :  { %2074 = vadd.xlane.f32.xlu1 %v2073_v12  ;;  %v3072_v56 = vpack.c.bf16 %v2264_v57, %v2263_v59 }
 0x901   :  { %v2066_v13 = vmul.f32 %v2062_v11, %v2062_v11 }
 0x903   :  { %v2076_v14 = vsel %vm223_vm4, %v2066_v13, 0.0 }
 0x904   :  { %2077 = vadd.xlane.f32.xlu0 %v2076_v14 }
 0x988   :  { %v2072_v19 = vpop.xlane.xlu0 %2071 }
 0x989   :  { %v2080_v26 = vmul.f32 0.03125, %v2072_v19  ;;  %v2069_v21 = vpop.xlane.xlu1 %2068 }
 0x98a   :  { %v2079_v23 = vmul.f32 0.03125, %v2069_v21 }
 0x98b   :  { %v2084_v25 = vadd.f32 1e-05, %v2080_v26 }
 0x98c   :  { %v2083_v27 = vadd.f32 1e-05, %v2079_v23 }
 0x98d   :  { %3136 = vrsqrt.f32 %v2084_v25  ;;  %v2075_v29 = vpop.xlane.xlu1 %2074 }
 0x98e   :  { %3138 = vrsqrt.f32 %v2083_v27  ;;  %v2081_v31 = vmul.f32 0.03125, %v2075_v29 }
 0x990   :  { %v2085_v34 = vadd.f32 1e-05, %v2081_v31 }
 0x991   :  { %v2078_v35 = vpop.xlane.xlu0 %2077 }
 0x992   :  { %3140 = vrsqrt.f32 %v2085_v34  ;;  %v2082_v36 = vmul.f32 0.03125, %v2078_v35 }
 0x994   :  { %v2086_v37 = vadd.f32 1e-05, %v2082_v36 }
 0x996   :  { %3142 = vrsqrt.f32 %v2086_v37 }
 0x997   :  { %v3137_v38 = vpop.eup %3136 }
 0x998   :  { %v3139_v40 = vpop.eup %3138  ;;  %v2092_v41 = vmul.f32 %v3137_v38, %v2060_v2  ;;  %v2638_v2 = vld [vmem:[%s3808_s15] ss:$0 sm:$0xff] }
 0x999   :  { %v2091_v42 = vmul.f32 %v3139_v40, %v2059_v3 }
 0x99a   :  { %v2102_v44 = vmul.f32 %v2636_v39, %v2092_v41 }
 0x99b   :  { %v2101_v45 = vmul.f32 %v2636_v39, %v2091_v42 }
 0x99c   :  { %v3141_v46 = vpop.eup %3140  ;;  %v3685_v49 = vadd.f32 %v2637_v43, %v2102_v44 }
 0x99d   :  { %v3683_v47 = vadd.f32 %v2637_v43, %v2101_v45  ;;  %v2093_v48 = vmul.f32 %v3141_v46, %v2061_v7 }
 0x99f   :  { %2953 = vmatprep.mubr.msk.f32.mxu1 %vm223_vm4, %v3683_v47  ;;  %v2103_v50 = vmul.f32 %v2636_v39, %v2093_v48 }
 0x9a0   :  { %v3143_v28 = vpop.eup %3142  ;;  %2954 = vmatmul.mubr.msk.f32.vlgmr.msra.gmra.mrb[28].mxu1 %vm223_vm4, %v3685_v49 }
 0x9a1   :  { %v3691_v51 = vadd.f32 %v2637_v43, %v2103_v50  ;;  %v2094_v30 = vmul.f32 %v3143_v28, %v2062_v11  ;;  %3067 = vmatpush3.bf16.msra.mxu1 %v3064_v54  ;;  %v2643_v28 = vld [vmem:[%s3810_s17] ss:$0 sm:$0xff] }
 0x9a2   :  { %3069 = vmatprep.subr.bf16.mxu1 %v3068_v58 }
 0x9a3   :  { %2956 = vmatprep.mubr.msk.f32.mxu1 %vm223_vm4, %v3691_v51  ;;  %v2104_v52 = vmul.f32 %v2636_v39, %v2094_v30 }
 0x9a5   :  { %v3695_v32 = vadd.f32 %v2637_v43, %v2104_v52  ;;  %3071 = vmatpush3.bf16.msra.mxu1 %v3068_v58 }
 0x9a6   :  { %3073 = vmatprep.subr.bf16.mxu1 %v3072_v56 }
 0x9a7   :  { %2957 = vmatmul.mubr.msk.f32.gmra.mrb[30].mxu1 %vm223_vm4, %v3695_v32 }
 0x9a9   :  { %3075 = vmatpush3.bf16.msra.mxu1 %v3072_v56 }
 0x9aa   :  { %3077 = vmatprep.subr.bf16.mxu1 %v3076_v1 }
 0x9ad   :  { %3079 = vmatpush3.bf16.msra.mxu1 %v3076_v1 }
 0xa73   :  { %v2955_v3 = vpop.f32.mrb[28].mxu1 }
 0xa74   :  { %v2210_v4 = vadd.f32 %v2955_v3, %v2638_v2  ;;  %v2204_v5 = vpop.f32.mrb[29].mxu1 }
 0xa75   :  { %v2205_v22 = vadd.f32 %v2638_v2, %v2204_v5 }
 0xa76   :  { %v2224_v6 = vmul.f32 %v2210_v4, %v2210_v4 }
 0xa77   :  { %v2223_v61 = vmul.f32 %v2205_v22, %v2205_v22 }
 0xa78   :  { %v2228_v7 = vmul.f32 %v2224_v6, %v2210_v4 }
 0xa79   :  { %v2227_v62 = vmul.f32 %v2223_v61, %v2205_v22 }
 0xa7a   :  { %v2232_v8 = vmul.f32 0.044715, %v2228_v7  ;;  %v2958_v9 = vpop.f32.mrb[30].mxu1 }
 0xa7b   :  { %v2231_v10 = vmul.f32 0.044715, %v2227_v62  ;;  %v2220_v11 = vadd.f32 %v2958_v9, %v2638_v2  ;;  %v2214_v12 = vpop.f32.mrb[31].mxu1 }
 0xa7c   :  { %v2236_v13 = vadd.f32 %v2232_v8, %v2210_v4  ;;  %v2215_v14 = vadd.f32 %v2638_v2, %v2214_v12 }
 0xa7d   :  { %v2235_v15 = vadd.f32 %v2231_v10, %v2205_v22  ;;  %v2226_v16 = vmul.f32 %v2220_v11, %v2220_v11 }
 0xa7e   :  { %v2240_v17 = vmul.f32 0.7978846, %v2236_v13  ;;  %v2225_v18 = vmul.f32 %v2215_v14, %v2215_v14 }
 0xa7f   :  { %v2239_v20 = vmul.f32 0.7978846, %v2235_v15  ;;  %v2230_v24 = vmul.f32 %v2226_v16, %v2220_v11 }
 0xa80   :  { %3144 = vtanh.f32 %v2240_v17  ;;  %v2229_v19 = vmul.f32 %v2225_v18, %v2215_v14  ;;  %v2468_v17 = vld [vmem:[%s3813_s20] sm:$0xff]  ;;  %v2469_v18 = vld [vmem:[%s3813_s20 + $0x8] sm:$0xff] }
 0xa81   :  { %3146 = vtanh.f32 %v2239_v20  ;;  %v2234_v26 = vmul.f32 0.044715, %v2230_v24  ;;  %v3081_v20 = vpack.c.bf16 %v2469_v18, %v2468_v17  ;;  %v2470_v24 = vld [vmem:[%s3813_s20 + $0x10] sm:$0xff] }
 0xa82   :  { %v2233_v21 = vmul.f32 0.044715, %v2229_v19  ;;  %v2471_v19 = vld [vmem:[%s3813_s20 + $0x18] sm:$0xff] }
 0xa83   :  { %v2238_v23 = vadd.f32 %v2234_v26, %v2220_v11  ;;  %v3213_v26 = vmov 0.0|0.0  }
 0xa84   :  { %v2237_v25 = vadd.f32 %v2233_v21, %v2215_v14  ;;  %3080 = vmatprep.subr.bf16.mxu0 %v3213_v26  ;;  %v3084_v21 = vpack.c.bf16 %v2471_v19, %v2470_v24 }
 0xa85   :  { %v2242_v27 = vmul.f32 0.7978846, %v2238_v23  ;;  %3082 = vmatpush3.bf16.msra.mxu0 %v3081_v20 }
 0xa86   :  { %v2241_v29 = vmul.f32 0.7978846, %v2237_v25  ;;  %3083 = vmatprep.subr.bf16.mxu0 %v3213_v26 }
 0xa87   :  { %3148 = vtanh.f32 %v2242_v27 }
 0xa88   :  { %3150 = vtanh.f32 %v2241_v29 }
 0xa89   :  { %3085 = vmatpush3.bf16.msra.mxu0 %v3084_v21 }
 0xa8a   :  { %v3145_v31 = vpop.eup %3144 }
 0xa8b   :  { %v3147_v34 = vpop.eup %3146  ;;  %v2248_v35 = vadd.f32 1.0, %v3145_v31 }
 0xa8c   :  { %v2247_v36 = vadd.f32 1.0, %v3147_v34 }
 0xa8d   :  { %v2252_v37 = vmul.f32 0.5, %v2248_v35 }
 0xa8e   :  { %v2251_v38 = vmul.f32 0.5, %v2247_v36 }
 0xa8f   :  { %v2256_v41 = vmul.f32 %v2252_v37, %v2210_v4 }
 0xa90   :  { %v2255_v39 = vmul.f32 %v2251_v38, %v2205_v22 }
 0xa91   :  { %v3149_v40 = vpop.eup %3148 }
 0xa92   :  { %v3151_v42 = vpop.eup %3150  ;;  %2975 = vmatprep.mubr.msk.f32.mxu1 %vm2274_vm8, %v2255_v39  ;;  %v2250_v43 = vadd.f32 1.0, %v3149_v40 }
 0xa93   :  { %2976 = vmatmul.mubr.msk.f32.vlgmr.msra.gmra.mrb[32].mxu1 %vm2274_vm8, %v2256_v41  ;;  %v2249_v44 = vadd.f32 1.0, %v3151_v42 }
 0xa94   :  { %v2254_v45 = vmul.f32 0.5, %v2250_v43  ;;  %v2648_v43 = vld [vmem:[%s3811_s18] ss:$0 sm:$0xff]  ;;  %s3214_s18 = smov [#allocation5]  }
 0xa95   :  { %v2253_v46 = vmul.f32 0.5, %v2249_v44 }
 0xa96   :  { %v2258_v50 = vmul.f32 %v2254_v45, %v2220_v11 }
 0xa97   :  { %v2257_v48 = vmul.f32 %v2253_v46, %v2215_v14 }
 0xa99   :  { %2978 = vmatprep.mubr.msk.f32.mxu1 %vm2274_vm8, %v2257_v48 }
 0xa9a   :  { %2979 = vmatmul.mubr.msk.f32.gmra.mrb[34].mxu1 %vm2274_vm8, %v2258_v50  ;;  %v2649_v50 = vld [vmem:[%s3812_s19] ss:$0 sm:$0xff]  ;;  %s2568_s19 = sshll.u32 %s3214_s18, 4  ;;  %s2569_s19 = int_to_ptr.vmem [resolvable:$true] %s2568_s19 }
 0xa9b   :  { %s3160_s4 = scalar_lea.vmem %s2569_s19, 32  ;;  %p3165_p1 = scmp.lt.s32.totalorder %s2569_s19, %s2569_s19 }
 0xa9c   :  { %p3161_p0 = scmp.ne.s32.totalorder %s2569_s19, %s3160_s4  ;;  %p3166_p2 = scmp.lt.s32.totalorder %s3160_s4, %s3160_s4 }
 0xa9e   :  { %p3167_p3 = por %p3166_p2, %p3165_p1 }
 0xaa0   :  { %p3168_p4 = pnand %p3167_p3, %p3161_p0 }
 0xb66   :  { %v2977_v30 = vpop.f32.mrb[32].mxu1 }
 0xb67   :  { %v2359_v52 = vadd.f32 %v2977_v30, %v2643_v28  ;;  %v2353_v53 = vpop.f32.mrb[33].mxu1 }
 0xb68   :  { %v2354_v33 = vadd.f32 %v2643_v28, %v2353_v53 }
 0xb69   :  { %v2373_v54 = vadd.f32 %v2359_v52, %v3685_v49 }
 0xb6a   :  { %v2372_v55 = vadd.f32 %v2354_v33, %v3683_v47 }
 0xb6b   :  { %v2381_v63 = vsel %vm223_vm4, %v2373_v54, 0.0 }
 0xb6c   :  { %2382 = vadd.xlane.f32.xlu1 %v2381_v63  ;;  %v2378_v60 = vsel %vm223_vm4, %v2372_v55, 0.0  ;;  %v2455_v63 = vstv %s2454_s3 }
 0xb6d   :  { %v2980_v58 = vpop.f32.mrb[34].mxu1 }
 0xb6e   :  { %v2369_v59 = vadd.f32 %v2980_v58, %v2643_v28  ;;  %v2363_v57 = vpop.f32.mrb[35].mxu1 }
 0xb6f   :  { %v2364_v56 = vadd.f32 %v2643_v28, %v2363_v57 }
 0xb70   :  { %2379 = vadd.xlane.f32.xlu1 %v2378_v60  ;;  %v2375_v0 = vadd.f32 %v2369_v59, %v3695_v32 }
 0xb71   :  { %v2374_v2 = vadd.f32 %v2364_v56, %v3691_v51 }
 0xb72   :  { %v2387_v1 = vsel %vm223_vm4, %v2375_v0, 0.0 }
 0xb73   :  { %2388 = vadd.xlane.f32.xlu0 %v2387_v1  ;;  %v2384_v49 = vsel %vm223_vm4, %v2374_v2, 0.0 }
 0xb77   :  { %2385 = vadd.xlane.f32.xlu0 %v2384_v49 }
 0xbf9   :  { %v2383_v3 = vpop.xlane.xlu1 %2382 }
 0xbfa   :  { %v2391_v47 = vmul.f32 0.03125, %v2383_v3 }
 0xbfc   :  { %v2395_v4 = vsub.f32 %v2373_v54, %v2391_v47  ;;  %v2451_v54 = vstv %s3837_s10 }
 0xbfd   :  { %v2380_v5 = vpop.xlane.xlu1 %2379 }
 0xbfe   :  { %v2390_v22 = vmul.f32 0.03125, %v2380_v5  ;;  %v2399_v6 = vmul.f32 %v2395_v4, %v2395_v4 }
 0xc00   :  { %v2394_v61 = vsub.f32 %v2372_v55, %v2390_v22  ;;  %v2389_v7 = vpop.xlane.xlu0 %2388  ;;  %v2405_v62 = vsel %vm223_vm4, %v2399_v6, 0.0 }
 0xc01   :  { %v2393_v8 = vmul.f32 0.03125, %v2389_v7  ;;  %2406 = vadd.xlane.f32.xlu1 %v2405_v62 }
 0xc02   :  { %v2398_v32 = vmul.f32 %v2394_v61, %v2394_v61 }
 0xc03   :  { %v2397_v9 = vsub.f32 %v2375_v0, %v2393_v8 }
 0xc04   :  { %v2386_v10 = vpop.xlane.xlu0 %2385  ;;  %v2402_v51 = vsel %vm223_vm4, %v2398_v32, 0.0 }
 0xc05   :  { %v2392_v11 = vmul.f32 0.03125, %v2386_v10  ;;  %2403 = vadd.xlane.f32.xlu1 %v2402_v51  ;;  %v2401_v12 = vmul.f32 %v2397_v9, %v2397_v9 }
 0xc07   :  { %v2396_v13 = vsub.f32 %v2374_v2, %v2392_v11  ;;  %v2411_v14 = vsel %vm223_vm4, %v2401_v12, 0.0 }
 0xc08   :  { %2412 = vadd.xlane.f32.xlu0 %v2411_v14 }
 0xc09   :  { %v2400_v15 = vmul.f32 %v2396_v13, %v2396_v13 }
 0xc0b   :  { %v2408_v16 = vsel %vm223_vm4, %v2400_v15, 0.0 }
 0xc0c   :  { %2409 = vadd.xlane.f32.xlu0 %v2408_v16 }
 0xc8e   :  { %v2407_v23 = vpop.xlane.xlu1 %2406 }
 0xc8f   :  { %v2415_v25 = vmul.f32 0.03125, %v2407_v23 }
 0xc91   :  { %v2419_v27 = vadd.f32 1e-05, %v2415_v25 }
 0xc92   :  { %v2404_v29 = vpop.xlane.xlu1 %2403 }
 0xc93   :  { %3152 = vrsqrt.f32 %v2419_v27  ;;  %v2414_v31 = vmul.f32 0.03125, %v2404_v29 }
 0xc95   :  { %v2418_v34 = vadd.f32 1e-05, %v2414_v31  ;;  %v2413_v35 = vpop.xlane.xlu0 %2412 }
 0xc96   :  { %v2417_v36 = vmul.f32 0.03125, %v2413_v35 }
 0xc97   :  { %3154 = vrsqrt.f32 %v2418_v34 }
 0xc98   :  { %v2421_v37 = vadd.f32 1e-05, %v2417_v36 }
 0xc99   :  { %v2410_v38 = vpop.xlane.xlu0 %2409 }
 0xc9a   :  { %3156 = vrsqrt.f32 %v2421_v37  ;;  %v2416_v39 = vmul.f32 0.03125, %v2410_v38 }
 0xc9c   :  { %v2420_v40 = vadd.f32 1e-05, %v2416_v39 }
 0xc9d   :  { %v3153_v41 = vpop.eup %3152 }
 0xc9e   :  { %3158 = vrsqrt.f32 %v2420_v40  ;;  %v2427_v42 = vmul.f32 %v3153_v41, %v2395_v4 }
 0xca0   :  { %v2437_v45 = vmul.f32 %v2648_v43, %v2427_v42 }
 0xca1   :  { %v3155_v44 = vpop.eup %3154 }
 0xca2   :  { %v2426_v46 = vmul.f32 %v3155_v44, %v2394_v61  ;;  %v2447_v30 = vadd.f32 %v2649_v50, %v2437_v45 }
 0xca4   :  { %v3157_v48 = vpop.eup %3156  ;;  %v2436_v52 = vmul.f32 %v2648_v43, %v2426_v46  ;;  %v2453_v56 = vmul.f32 %v2451_v54, %v2447_v30 }
 0xca5   :  { %v2429_v28 = vmul.f32 %v3157_v48, %v2397_v9 }
 0xca6   :  { %v2446_v59 = vadd.f32 %v2649_v50, %v2436_v52 }
 0xca7   :  { %v2439_v53 = vmul.f32 %v2648_v43, %v2429_v28 }
 0xca8   :  { %v3159_v33 = vpop.eup %3158  ;;  %v2452_v2 = vmul.f32 %v2451_v54, %v2446_v59 }
 0xca9   :  { %v2449_v55 = vadd.f32 %v2649_v50, %v2439_v53  ;;  %v2428_v58 = vmul.f32 %v3159_v33, %v2396_v13 }
 0xcab   :  { %v2438_v57 = vmul.f32 %v2648_v43, %v2428_v58  ;;  %v2457_v60 = vmul.f32 %v2455_v63, %v2449_v55 }
 0xcad   :  { %v2448_v0 = vadd.f32 %v2649_v50, %v2438_v57  ;;  %v2459_v1 = vadd.f32 %v2457_v60, %v2453_v56 }
 0xcaf   :  { %v2456_v49 = vmul.f32 %v2455_v63, %v2448_v0  ;;  %v2462_v47 = vrot.slane %v2459_v1, 7 }
 0xcb1   :  { %v2458_v3 = vadd.f32 %v2456_v49, %v2452_v2 }
 0xcb3   :  { %v2464_v4 = vsel %vm2463_vm9, %v2462_v47, %v2458_v3 }
 0xcb4   :  { %2990 = vmatmul.mubr.msk.f32.vlgmr.msra.gmra.mrb[24].mxu0 %vm223_vm4, %v2464_v4  ;;  %2467 = vst.msk [vmem:[#allocation5] sm:$0x3] %vm2466_vm10, %v2464_v4 }
 0xcb5   :  { %3171 = shalt.err (!%p3168_p4)
}
 0xcb6   :  { %s3172_s1 = scalar_lea.hbm %s3816_s23, 32 }
 0xcb7   :  { %p3173_p5 = scmp.ne.s32.totalorder %s3816_s23, %s3172_s1  ;;  %p3176_p6 = scmp.lt.u32.totalorder %s3172_s1, %s3816_s23 }
 0xcb9   :  { %p3178_p7 = pnand %p3176_p6, %p3173_p5 }
 0xcbb   :  { %3181 = shalt.err (!%p3178_p7)
}
 0xcbc   :  { %2571 = dma.vmem_to_hbm [thread:$0]  %s2569_s19, 32, %s3816_s23, [#allocation6]   ;;  %v2650_v5 = vld [vmem:[%s3814_s21] ss:$0 sm:$0xff] }
 0xcbd   :  { %s3215_s5 = smov [#allocation3]  }
 0xcbe   :  { %s2558_s12 = sshll.u32 %s3215_s5, 4  ;;  %s2559_s12 = int_to_ptr.vmem [resolvable:$true] %s2558_s12 }
 0xcbf   :  { %s3182_s13 = scalar_lea.vmem %s2559_s12, 32  ;;  %p3187_p9 = scmp.lt.s32.totalorder %s2559_s12, %s2559_s12 }
 0xcc0   :  { %p3183_p8 = scmp.ne.s32.totalorder %s2559_s12, %s3182_s13  ;;  %p3188_p10 = scmp.lt.s32.totalorder %s3182_s13, %s3182_s13 }
 0xcc2   :  { %p3189_p11 = por %p3188_p10, %p3187_p9 }
 0xcc4   :  { %p3190_p12 = pnand %p3189_p11, %p3183_p8 }
 0xd87   :  { %v2547_v22 = vpop.f32.mrb[24].mxu0 }
 0xd88   :  { %v2548_v6 = vadd.f32 %v2650_v5, %v2547_v22  ;;  %v2991_v61 = vpop.f32.mrb[25].mxu0 }
 0xd8a   :  { %2551 = vst [vmem:[#allocation3] sm:$0x3] %v2548_v6 }
 0xd8b   :  { %3193 = shalt.err (!%p3190_p12)
}
 0xd8c   :  { %s3194_s20 = scalar_lea.hbm %s3815_s22, 32 }
 0xd8d   :  { %p3195_p13 = scmp.ne.s32.totalorder %s3815_s22, %s3194_s20  ;;  %p3198_p0 = scmp.lt.u32.totalorder %s3194_s20, %s3815_s22 }
 0xd8f   :  { %p3200_p1 = pnand %p3198_p0, %p3195_p13 }
 0xd91   :  { %3203 = shalt.err (!%p3200_p1)
}
 0xd92   :  { %2561 = dma.vmem_to_hbm [thread:$0]  %s2559_s12, 32, %s3815_s22, [#allocation4]  }
 0xd93   :  { %3204 = dma.done.wait [#allocation4], 32  }
 0xd94   :  { %3205 = vsyncadd [#allocation4], 4294967264 }
 0xd95   :  { %3206 = dma.done.wait [#allocation6], 32  }
 0xd96   :  { %3207 = vsyncadd [#allocation6], 4294967264 }
 0xd97   :  { %2578 = vsyncpa [#allocation4], 1 }
 0xd98   :  { %2579 = vsyncpa [#allocation6], 1 }

</bundles_post_ra>
